<compile_context>
chip_gen: v7x
topology: tpu7x:2x2x1
jax: 0.10.0
libtpu: 0.0.40
codegen_flags: <defaults>
</compile_context>

<pallas_src>
import functools

import jax
import jax.numpy as jnp
from jax.experimental import pallas as pl
from jax.experimental.pallas import tpu as pltpu

_LANE = 128  # per-gate padded width G (= vreg lane width)


def _sigmoid(x):
    # One EUP op (tanh) + cheap VPU mul/add; sigmoid(0) == 0.5 exactly, so the
    # zero-padded-lane invariant (see pack_params) is preserved.
    return 0.5 * jnp.tanh(0.5 * x) + 0.5


def _bilstm_fc_kernel(tok_ref,    # (B, T)      int32 SMEM  token ids
                      emb_ref,    # (V, 1, E)   f32   VMEM  embedding table
                      w_ref,      # (2E+G, 4G)  bf16  VMEM  [wih_f ; whh_f ; wih_b]
                      fcw_ref,    # (2G, Op)    bf16  VMEM  fc weight [fwd ; bwd]
                      bias_ref,   # (3, 4G)     f32   VMEM  [b_f ; b_b ; fc_b(pad)]
                      out_ref,    # (B, O)      f32   VMEM  logits
                      x_scr):     # (T*B, E)    f32   VMEM  gathered embeddings
    B, T = tok_ref.shape
    E = emb_ref.shape[2]
    G = w_ref.shape[1] // 4
    Op = fcw_ref.shape[1]
    O = out_ref.shape[1]

    # ---- In-kernel embedding gather, time-major (row r = t*B + b) ---------
    # Dynamic index on the leading (untiled) axis of the (V, 1, E) table;
    # destinations are static rows of the VMEM scratch.
    for t in range(T):
        for b in range(B):
            r = t * B + b
            x_scr[r:r + 1, :] = emb_ref[tok_ref[b, t]]
    x = x_scr[...].astype(jnp.bfloat16)                       # (T*B, E) bf16

    # ---- Static views into the packed buffers (all tile-aligned offsets) --
    wih_f = w_ref[0:E, :]                                     # (E, 4G)
    whh_lo = w_ref[E:E + G, 0:2 * G]                          # (G, 2G)  gates i|f
    whh_hi = w_ref[E:E + G, 2 * G:4 * G]                      # (G, 2G)  gates g|o
    wih_b = w_ref[E + G:2 * E + G, :]                         # (E, 4G)
    b_f = bias_ref[0:1, :]                                    # (1, 4G)
    b_b = bias_ref[1:2, :]                                    # (1, 4G)
    fc_b = bias_ref[2:3, 0:Op]                                # (1, Op)

    # ---- Hoisted input projection: one MXU pass covers all T steps --------
    pre = jnp.dot(x, wih_f, preferred_element_type=jnp.float32) + b_f   # (T*B, 4G) f32

    # ---- Forward recurrence, fully unrolled; t = 0 peeled (h = c = 0) -----
    g0 = pre[0:B, :]
    i0 = _sigmoid(g0[:, 0:G])
    gg0 = jnp.tanh(g0[:, 2 * G:3 * G])
    o0 = _sigmoid(g0[:, 3 * G:4 * G])
    c = i0 * gg0                                              # f * c0 == 0
    h = o0 * jnp.tanh(c)

    for t in range(1, T):
        hb = h.astype(jnp.bfloat16)
        pre_t = pre[t * B:(t + 1) * B, :]
        # Two 256-wide halves: activation of one half overlaps the MXU pop of
        # the other inside each serial step.
        acc_lo = pre_t[:, 0:2 * G] + jnp.dot(
            hb, whh_lo, preferred_element_type=jnp.float32)   # (B, 2G) gates i|f
        acc_hi = pre_t[:, 2 * G:4 * G] + jnp.dot(
            hb, whh_hi, preferred_element_type=jnp.float32)   # (B, 2G) gates g|o
        i = _sigmoid(acc_lo[:, 0:G])
        f = _sigmoid(acc_lo[:, G:2 * G])
        g = jnp.tanh(acc_hi[:, 0:G])
        o = _sigmoid(acc_hi[:, G:2 * G])
        c = f * c + i * g
        h = o * jnp.tanh(c)
    h_fwd = h

    # ---- Backward direction at t = T-1: first step of the reversed scan ---
    # from a zero state => h0 @ W_hh_bwd == 0 and f * c0 == 0.
    gates_b = jnp.dot(x[(T - 1) * B:T * B, :], wih_b,
                      preferred_element_type=jnp.float32) + b_b
    i_b = _sigmoid(gates_b[:, 0:G])
    g_b = jnp.tanh(gates_b[:, 2 * G:3 * G])
    o_b = _sigmoid(gates_b[:, 3 * G:4 * G])
    h_bwd = o_b * jnp.tanh(i_b * g_b)

    # ---- Fused final linear: one matmul on concat([h_fwd, h_bwd]) ---------
    hcat = jnp.concatenate([h_fwd, h_bwd], axis=1).astype(jnp.bfloat16)  # (B, 2G)
    res = jnp.dot(hcat, fcw_ref[...], preferred_element_type=jnp.float32) + fc_b
    out_ref[...] = res[:, 0:O]                                # final slice fused


@functools.partial(jax.jit, static_argnames=("output_dim",))
def text_generation_forward(tokens, kp, *, output_dim):
    """tokens: (B, T) int32 -> logits (B, output_dim) float32 (single kernel)."""
    B, T = tokens.shape
    E = kp["embedding"].shape[2]
    smem = pl.BlockSpec(memory_space=pltpu.MemorySpace.SMEM)
    vmem = pl.BlockSpec(memory_space=pltpu.MemorySpace.VMEM)
    return pl.pallas_call(
        _bilstm_fc_kernel,
        out_shape=jax.ShapeDtypeStruct((B, output_dim), jnp.float32),
        in_specs=[smem, vmem, vmem, vmem, vmem],
        out_specs=vmem,
        scratch_shapes=[pltpu.VMEM((T * B, E), jnp.float32)],
    )(tokens, kp["embedding"], kp["w"], kp["fcw"], kp["bias"])


def init_params(key, vocab_size, embed_dim, hidden_dim, output_dim):
    """Deterministic synthetic parameters in the torch module's native shapes."""
    ks = jax.random.split(key, 12)
    s = 1.0 / float(hidden_dim) ** 0.5

    def u(k, shape):
        return jax.random.uniform(k, shape, jnp.float32, -s, s)

    H, E, V, O = hidden_dim, embed_dim, vocab_size, output_dim
    return {
        "embedding": jax.random.normal(ks[0], (V, E), jnp.float32) * 0.1,
        # torch nn.LSTM params, gate order [i | f | g | o]:
        "w_ih_f": u(ks[1], (4 * H, E)), "w_hh_f": u(ks[2], (4 * H, H)),
        "b_ih_f": u(ks[3], (4 * H,)),   "b_hh_f": u(ks[4], (4 * H,)),
        "w_ih_b": u(ks[5], (4 * H, E)), "w_hh_b": u(ks[6], (4 * H, H)),
        "b_ih_b": u(ks[7], (4 * H,)),   "b_hh_b": u(ks[8], (4 * H,)),
        # torch nn.Linear(2H, O): weight (O, 2H), bias (O,).
        "fc_w": u(ks[9], (O, 2 * H)),   "fc_b": u(ks[10], (O,)),
    }


def pack_params(p, hidden_dim, output_dim):
    """Torch-layout params -> kernel layout.

    Right-matmul orientation; each gate zero-padded H -> G=128 lanes (keeps the
    padded lanes of h/c identically zero through the recurrence); the three
    bf16 LSTM weights packed into one buffer, the three f32 biases into one
    buffer, the fc weight pre-split per direction and concatenated along K."""
    H, O, G = hidden_dim, output_dim, _LANE
    Op = ((O + _LANE - 1) // _LANE) * _LANE
    V, E = p["embedding"].shape

    def pad_gates(w_t):                         # (rows, 4H) -> (rows, 4G)
        blocks = [jnp.pad(w_t[:, k * H:(k + 1) * H], ((0, 0), (0, G - H)))
                  for k in range(4)]
        return jnp.concatenate(blocks, axis=1)

    wih_f = pad_gates(p["w_ih_f"].T)                                    # (E, 4G)
    whh_f = jnp.pad(pad_gates(p["w_hh_f"].T), ((0, G - H), (0, 0)))     # (G, 4G)
    wih_b = pad_gates(p["w_ih_b"].T)                                    # (E, 4G)
    # p["w_hh_b"] is mathematically unused: only out[:, -1, :] is read and the
    # backward scan's first step starts from h0 == 0.
    w = jnp.concatenate([wih_f, whh_f, wih_b], axis=0).astype(jnp.bfloat16)

    b_f = pad_gates((p["b_ih_f"] + p["b_hh_f"])[None, :])               # (1, 4G)
    b_b = pad_gates((p["b_ih_b"] + p["b_hh_b"])[None, :])               # (1, 4G)
    fc_b = jnp.pad(p["fc_b"][None, :], ((0, 0), (0, 4 * G - O)))        # (1, 4G)
    bias = jnp.concatenate([b_f, b_b, fc_b], axis=0)                    # (3, 4G) f32

    fcw_f = jnp.pad(p["fc_w"][:, :H].T, ((0, G - H), (0, Op - O)))      # (G, Op)
    fcw_b = jnp.pad(p["fc_w"][:, H:].T, ((0, G - H), (0, Op - O)))      # (G, Op)
    fcw = jnp.concatenate([fcw_f, fcw_b], axis=0).astype(jnp.bfloat16)  # (2G, Op)

    return {"embedding": p["embedding"].reshape(V, 1, E),  # leading-axis gather
            "w": w, "fcw": fcw, "bias": bias}


def _reference_forward(tokens, p):
    """Pure-JAX f32 reference of the torch forward (only what the head reads)."""
    H = p["w_hh_f"].shape[1]
    B, T = tokens.shape
    x = jnp.take(p["embedding"], tokens, axis=0)            # (B, T, E)

    def cell(x_t, h, c, w_ih, w_hh, b_ih, b_hh):
        gates = x_t @ w_ih.T + h @ w_hh.T + b_ih + b_hh
        i = jax.nn.sigmoid(gates[:, 0 * H:1 * H])
        f = jax.nn.sigmoid(gates[:, 1 * H:2 * H])
        g = jnp.tanh(gates[:, 2 * H:3 * H])
        o = jax.nn.sigmoid(gates[:, 3 * H:4 * H])
        c = f * c + i * g
        return o * jnp.tanh(c), c

    h = jnp.zeros((B, H), jnp.float32)
    c = jnp.zeros((B, H), jnp.float32)
    for t in range(T):
        h, c = cell(x[:, t, :], h, c,
                    p["w_ih_f"], p["w_hh_f"], p["b_ih_f"], p["b_hh_f"])
    h_fwd = h
    h_bwd, _ = cell(x[:, T - 1, :], jnp.zeros_like(h), jnp.zeros_like(c),
                    p["w_ih_b"], p["w_hh_b"], p["b_ih_b"], p["b_hh_b"])
    return jnp.concatenate([h_fwd, h_bwd], axis=1) @ p["fc_w"].T + p["fc_b"]


if __name__ == "__main__":
    V, E, H, O = 50, 32, 32, 50      # vocab, embed dim, hidden dim, output dim
    B, T = 2, 8                      # batch, sequence length

    key = jax.random.PRNGKey(0)
    pkey, tkey = jax.random.split(key)
    torch_params = init_params(pkey, V, E, H, O)
    kparams = pack_params(torch_params, hidden_dim=H, output_dim=O)
    tokens = jax.random.randint(tkey, (B, T), 0, V, dtype=jnp.int32)

    logits = text_generation_forward(tokens, kparams, output_dim=O)
    jax.block_until_ready(logits)
    assert logits.shape == (B, O), logits.shape
    assert logits.dtype == jnp.float32
    assert bool(jnp.all(jnp.isfinite(logits)))

    # Numerical check vs f32 reference (bf16 weights -> loose tolerance).
    ref = _reference_forward(tokens, torch_params)
    assert bool(jnp.allclose(logits, ref, rtol=5e-2, atol=5e-2)), (
        "max abs err = %f" % float(jnp.max(jnp.abs(logits - ref))))
    print("KERNEL_OK")
</pallas_src>

<mosaic_0001>
module attributes {stable_mosaic.version = 11 : i64} {
  func.func @_bilstm_fc_kernel(%arg0: memref<2x8xi32, #tpu.memory_space<smem>>, %arg1: memref<50x1x32xf32, #tpu.memory_space<vmem>>, %arg2: memref<192x512xbf16, #tpu.memory_space<vmem>>, %arg3: memref<256x128xbf16, #tpu.memory_space<vmem>>, %arg4: memref<3x512xf32, #tpu.memory_space<vmem>>, %arg5: memref<2x50xf32, #tpu.memory_space<vmem>>, %arg6: memref<16x32xf32, #tpu.memory_space<vmem>>) attributes {dimension_semantics = [], scalar_prefetch = 0 : i64, scratch_operands = 1 : i64, tpu.core_type = #tpu.core_type<tc>} {
    %c0 = arith.constant 0 : index
    %c0_0 = arith.constant 0 : index
    %0 = memref.load %arg0[%c0, %c0_0] : memref<2x8xi32, #tpu.memory_space<smem>>
    %1 = arith.index_cast %0 : i32 to index
    %c0_1 = arith.constant 0 : index
    %c0_2 = arith.constant 0 : index
    %2 = vector.load %arg1[%1, %c0_1, %c0_2] : memref<50x1x32xf32, #tpu.memory_space<vmem>>, vector<1x1x32xf32>
    %3 = vector.shape_cast %2 : vector<1x1x32xf32> to vector<1x32xf32>
    %c0_3 = arith.constant 0 : index
    %c0_4 = arith.constant 0 : index
    %4 = vector.load %arg6[%c0_3, %c0_4] : memref<16x32xf32, #tpu.memory_space<vmem>>, vector<1x32xf32>
    tpu.vector_store %arg6[%c0_3, %c0_4], %3 {strides = array<i32>} : memref<16x32xf32, #tpu.memory_space<vmem>>, vector<1x32xf32>,
    %c1 = arith.constant 1 : index
    %c0_5 = arith.constant 0 : index
    %5 = memref.load %arg0[%c1, %c0_5] : memref<2x8xi32, #tpu.memory_space<smem>>
    %6 = arith.index_cast %5 : i32 to index
    %c0_6 = arith.constant 0 : index
    %c0_7 = arith.constant 0 : index
    %7 = vector.load %arg1[%6, %c0_6, %c0_7] : memref<50x1x32xf32, #tpu.memory_space<vmem>>, vector<1x1x32xf32>
    %8 = vector.shape_cast %7 : vector<1x1x32xf32> to vector<1x32xf32>
    %c1_8 = arith.constant 1 : index
    %c0_9 = arith.constant 0 : index
    %9 = vector.load %arg6[%c1_8, %c0_9] : memref<16x32xf32, #tpu.memory_space<vmem>>, vector<1x32xf32>
    tpu.vector_store %arg6[%c1_8, %c0_9], %8 {strides = array<i32>} : memref<16x32xf32, #tpu.memory_space<vmem>>, vector<1x32xf32>,
    %c0_10 = arith.constant 0 : index
    %c1_11 = arith.constant 1 : index
    %10 = memref.load %arg0[%c0_10, %c1_11] : memref<2x8xi32, #tpu.memory_space<smem>>
    %11 = arith.index_cast %10 : i32 to index
    %c0_12 = arith.constant 0 : index
    %c0_13 = arith.constant 0 : index
    %12 = vector.load %arg1[%11, %c0_12, %c0_13] : memref<50x1x32xf32, #tpu.memory_space<vmem>>, vector<1x1x32xf32>
    %13 = vector.shape_cast %12 : vector<1x1x32xf32> to vector<1x32xf32>
    %c2 = arith.constant 2 : index
    %c0_14 = arith.constant 0 : index
    %14 = vector.load %arg6[%c2, %c0_14] : memref<16x32xf32, #tpu.memory_space<vmem>>, vector<1x32xf32>
    tpu.vector_store %arg6[%c2, %c0_14], %13 {strides = array<i32>} : memref<16x32xf32, #tpu.memory_space<vmem>>, vector<1x32xf32>,
    %c1_15 = arith.constant 1 : index
    %c1_16 = arith.constant 1 : index
    %15 = memref.load %arg0[%c1_15, %c1_16] : memref<2x8xi32, #tpu.memory_space<smem>>
    %16 = arith.index_cast %15 : i32 to index
    %c0_17 = arith.constant 0 : index
    %c0_18 = arith.constant 0 : index
    %17 = vector.load %arg1[%16, %c0_17, %c0_18] : memref<50x1x32xf32, #tpu.memory_space<vmem>>, vector<1x1x32xf32>
    %18 = vector.shape_cast %17 : vector<1x1x32xf32> to vector<1x32xf32>
    %c3 = arith.constant 3 : index
    %c0_19 = arith.constant 0 : index
    %19 = vector.load %arg6[%c3, %c0_19] : memref<16x32xf32, #tpu.memory_space<vmem>>, vector<1x32xf32>
    tpu.vector_store %arg6[%c3, %c0_19], %18 {strides = array<i32>} : memref<16x32xf32, #tpu.memory_space<vmem>>, vector<1x32xf32>,
    %c0_20 = arith.constant 0 : index
    %c2_21 = arith.constant 2 : index
    %20 = memref.load %arg0[%c0_20, %c2_21] : memref<2x8xi32, #tpu.memory_space<smem>>
    %21 = arith.index_cast %20 : i32 to index
    %c0_22 = arith.constant 0 : index
    %c0_23 = arith.constant 0 : index
    %22 = vector.load %arg1[%21, %c0_22, %c0_23] : memref<50x1x32xf32, #tpu.memory_space<vmem>>, vector<1x1x32xf32>
    %23 = vector.shape_cast %22 : vector<1x1x32xf32> to vector<1x32xf32>
    %c4 = arith.constant 4 : index
    %c0_24 = arith.constant 0 : index
    %24 = vector.load %arg6[%c4, %c0_24] : memref<16x32xf32, #tpu.memory_space<vmem>>, vector<1x32xf32>
    tpu.vector_store %arg6[%c4, %c0_24], %23 {strides = array<i32>} : memref<16x32xf32, #tpu.memory_space<vmem>>, vector<1x32xf32>,
    %c1_25 = arith.constant 1 : index
    %c2_26 = arith.constant 2 : index
    %25 = memref.load %arg0[%c1_25, %c2_26] : memref<2x8xi32, #tpu.memory_space<smem>>
    %26 = arith.index_cast %25 : i32 to index
    %c0_27 = arith.constant 0 : index
    %c0_28 = arith.constant 0 : index
    %27 = vector.load %arg1[%26, %c0_27, %c0_28] : memref<50x1x32xf32, #tpu.memory_space<vmem>>, vector<1x1x32xf32>
    %28 = vector.shape_cast %27 : vector<1x1x32xf32> to vector<1x32xf32>
    %c5 = arith.constant 5 : index
    %c0_29 = arith.constant 0 : index
    %29 = vector.load %arg6[%c5, %c0_29] : memref<16x32xf32, #tpu.memory_space<vmem>>, vector<1x32xf32>
    tpu.vector_store %arg6[%c5, %c0_29], %28 {strides = array<i32>} : memref<16x32xf32, #tpu.memory_space<vmem>>, vector<1x32xf32>,
    %c0_30 = arith.constant 0 : index
    %c3_31 = arith.constant 3 : index
    %30 = memref.load %arg0[%c0_30, %c3_31] : memref<2x8xi32, #tpu.memory_space<smem>>
    %31 = arith.index_cast %30 : i32 to index
    %c0_32 = arith.constant 0 : index
    %c0_33 = arith.constant 0 : index
    %32 = vector.load %arg1[%31, %c0_32, %c0_33] : memref<50x1x32xf32, #tpu.memory_space<vmem>>, vector<1x1x32xf32>
    %33 = vector.shape_cast %32 : vector<1x1x32xf32> to vector<1x32xf32>
    %c6 = arith.constant 6 : index
    %c0_34 = arith.constant 0 : index
    %34 = vector.load %arg6[%c6, %c0_34] : memref<16x32xf32, #tpu.memory_space<vmem>>, vector<1x32xf32>
    tpu.vector_store %arg6[%c6, %c0_34], %33 {strides = array<i32>} : memref<16x32xf32, #tpu.memory_space<vmem>>, vector<1x32xf32>,
    %c1_35 = arith.constant 1 : index
    %c3_36 = arith.constant 3 : index
    %35 = memref.load %arg0[%c1_35, %c3_36] : memref<2x8xi32, #tpu.memory_space<smem>>
    %36 = arith.index_cast %35 : i32 to index
    %c0_37 = arith.constant 0 : index
    %c0_38 = arith.constant 0 : index
    %37 = vector.load %arg1[%36, %c0_37, %c0_38] : memref<50x1x32xf32, #tpu.memory_space<vmem>>, vector<1x1x32xf32>
    %38 = vector.shape_cast %37 : vector<1x1x32xf32> to vector<1x32xf32>
    %c7 = arith.constant 7 : index
    %c0_39 = arith.constant 0 : index
    %39 = vector.load %arg6[%c7, %c0_39] : memref<16x32xf32, #tpu.memory_space<vmem>>, vector<1x32xf32>
    tpu.vector_store %arg6[%c7, %c0_39], %38 {strides = array<i32>} : memref<16x32xf32, #tpu.memory_space<vmem>>, vector<1x32xf32>,
    %c0_40 = arith.constant 0 : index
    %c4_41 = arith.constant 4 : index
    %40 = memref.load %arg0[%c0_40, %c4_41] : memref<2x8xi32, #tpu.memory_space<smem>>
    %41 = arith.index_cast %40 : i32 to index
    %c0_42 = arith.constant 0 : index
    %c0_43 = arith.constant 0 : index
    %42 = vector.load %arg1[%41, %c0_42, %c0_43] : memref<50x1x32xf32, #tpu.memory_space<vmem>>, vector<1x1x32xf32>
    %43 = vector.shape_cast %42 : vector<1x1x32xf32> to vector<1x32xf32>
    %c8 = arith.constant 8 : index
    %c0_44 = arith.constant 0 : index
    %44 = vector.load %arg6[%c8, %c0_44] : memref<16x32xf32, #tpu.memory_space<vmem>>, vector<1x32xf32>
    tpu.vector_store %arg6[%c8, %c0_44], %43 {strides = array<i32>} : memref<16x32xf32, #tpu.memory_space<vmem>>, vector<1x32xf32>,
    %c1_45 = arith.constant 1 : index
    %c4_46 = arith.constant 4 : index
    %45 = memref.load %arg0[%c1_45, %c4_46] : memref<2x8xi32, #tpu.memory_space<smem>>
    %46 = arith.index_cast %45 : i32 to index
    %c0_47 = arith.constant 0 : index
    %c0_48 = arith.constant 0 : index
    %47 = vector.load %arg1[%46, %c0_47, %c0_48] : memref<50x1x32xf32, #tpu.memory_space<vmem>>, vector<1x1x32xf32>
    %48 = vector.shape_cast %47 : vector<1x1x32xf32> to vector<1x32xf32>
    %c9 = arith.constant 9 : index
    %c0_49 = arith.constant 0 : index
    %49 = vector.load %arg6[%c9, %c0_49] : memref<16x32xf32, #tpu.memory_space<vmem>>, vector<1x32xf32>
    tpu.vector_store %arg6[%c9, %c0_49], %48 {strides = array<i32>} : memref<16x32xf32, #tpu.memory_space<vmem>>, vector<1x32xf32>,
    %c0_50 = arith.constant 0 : index
    %c5_51 = arith.constant 5 : index
    %50 = memref.load %arg0[%c0_50, %c5_51] : memref<2x8xi32, #tpu.memory_space<smem>>
    %51 = arith.index_cast %50 : i32 to index
    %c0_52 = arith.constant 0 : index
    %c0_53 = arith.constant 0 : index
    %52 = vector.load %arg1[%51, %c0_52, %c0_53] : memref<50x1x32xf32, #tpu.memory_space<vmem>>, vector<1x1x32xf32>
    %53 = vector.shape_cast %52 : vector<1x1x32xf32> to vector<1x32xf32>
    %c10 = arith.constant 10 : index
    %c0_54 = arith.constant 0 : index
    %54 = vector.load %arg6[%c10, %c0_54] : memref<16x32xf32, #tpu.memory_space<vmem>>, vector<1x32xf32>
    tpu.vector_store %arg6[%c10, %c0_54], %53 {strides = array<i32>} : memref<16x32xf32, #tpu.memory_space<vmem>>, vector<1x32xf32>,
    %c1_55 = arith.constant 1 : index
    %c5_56 = arith.constant 5 : index
    %55 = memref.load %arg0[%c1_55, %c5_56] : memref<2x8xi32, #tpu.memory_space<smem>>
    %56 = arith.index_cast %55 : i32 to index
    %c0_57 = arith.constant 0 : index
    %c0_58 = arith.constant 0 : index
    %57 = vector.load %arg1[%56, %c0_57, %c0_58] : memref<50x1x32xf32, #tpu.memory_space<vmem>>, vector<1x1x32xf32>
    %58 = vector.shape_cast %57 : vector<1x1x32xf32> to vector<1x32xf32>
    %c11 = arith.constant 11 : index
    %c0_59 = arith.constant 0 : index
    %59 = vector.load %arg6[%c11, %c0_59] : memref<16x32xf32, #tpu.memory_space<vmem>>, vector<1x32xf32>
    tpu.vector_store %arg6[%c11, %c0_59], %58 {strides = array<i32>} : memref<16x32xf32, #tpu.memory_space<vmem>>, vector<1x32xf32>,
    %c0_60 = arith.constant 0 : index
    %c6_61 = arith.constant 6 : index
    %60 = memref.load %arg0[%c0_60, %c6_61] : memref<2x8xi32, #tpu.memory_space<smem>>
    %61 = arith.index_cast %60 : i32 to index
    %c0_62 = arith.constant 0 : index
    %c0_63 = arith.constant 0 : index
    %62 = vector.load %arg1[%61, %c0_62, %c0_63] : memref<50x1x32xf32, #tpu.memory_space<vmem>>, vector<1x1x32xf32>
    %63 = vector.shape_cast %62 : vector<1x1x32xf32> to vector<1x32xf32>
    %c12 = arith.constant 12 : index
    %c0_64 = arith.constant 0 : index
    %64 = vector.load %arg6[%c12, %c0_64] : memref<16x32xf32, #tpu.memory_space<vmem>>, vector<1x32xf32>
    tpu.vector_store %arg6[%c12, %c0_64], %63 {strides = array<i32>} : memref<16x32xf32, #tpu.memory_space<vmem>>, vector<1x32xf32>,
    %c1_65 = arith.constant 1 : index
    %c6_66 = arith.constant 6 : index
    %65 = memref.load %arg0[%c1_65, %c6_66] : memref<2x8xi32, #tpu.memory_space<smem>>
    %66 = arith.index_cast %65 : i32 to index
    %c0_67 = arith.constant 0 : index
    %c0_68 = arith.constant 0 : index
    %67 = vector.load %arg1[%66, %c0_67, %c0_68] : memref<50x1x32xf32, #tpu.memory_space<vmem>>, vector<1x1x32xf32>
    %68 = vector.shape_cast %67 : vector<1x1x32xf32> to vector<1x32xf32>
    %c13 = arith.constant 13 : index
    %c0_69 = arith.constant 0 : index
    %69 = vector.load %arg6[%c13, %c0_69] : memref<16x32xf32, #tpu.memory_space<vmem>>, vector<1x32xf32>
    tpu.vector_store %arg6[%c13, %c0_69], %68 {strides = array<i32>} : memref<16x32xf32, #tpu.memory_space<vmem>>, vector<1x32xf32>,
    %c0_70 = arith.constant 0 : index
    %c7_71 = arith.constant 7 : index
    %70 = memref.load %arg0[%c0_70, %c7_71] : memref<2x8xi32, #tpu.memory_space<smem>>
    %71 = arith.index_cast %70 : i32 to index
    %c0_72 = arith.constant 0 : index
    %c0_73 = arith.constant 0 : index
    %72 = vector.load %arg1[%71, %c0_72, %c0_73] : memref<50x1x32xf32, #tpu.memory_space<vmem>>, vector<1x1x32xf32>
    %73 = vector.shape_cast %72 : vector<1x1x32xf32> to vector<1x32xf32>
    %c14 = arith.constant 14 : index
    %c0_74 = arith.constant 0 : index
    %74 = vector.load %arg6[%c14, %c0_74] : memref<16x32xf32, #tpu.memory_space<vmem>>, vector<1x32xf32>
    tpu.vector_store %arg6[%c14, %c0_74], %73 {strides = array<i32>} : memref<16x32xf32, #tpu.memory_space<vmem>>, vector<1x32xf32>,
    %c1_75 = arith.constant 1 : index
    %c7_76 = arith.constant 7 : index
    %75 = memref.load %arg0[%c1_75, %c7_76] : memref<2x8xi32, #tpu.memory_space<smem>>
    %76 = arith.index_cast %75 : i32 to index
    %c0_77 = arith.constant 0 : index
    %c0_78 = arith.constant 0 : index
    %77 = vector.load %arg1[%76, %c0_77, %c0_78] : memref<50x1x32xf32, #tpu.memory_space<vmem>>, vector<1x1x32xf32>
    %78 = vector.shape_cast %77 : vector<1x1x32xf32> to vector<1x32xf32>
    %c15 = arith.constant 15 : index
    %c0_79 = arith.constant 0 : index
    %79 = vector.load %arg6[%c15, %c0_79] : memref<16x32xf32, #tpu.memory_space<vmem>>, vector<1x32xf32>
    tpu.vector_store %arg6[%c15, %c0_79], %78 {strides = array<i32>} : memref<16x32xf32, #tpu.memory_space<vmem>>, vector<1x32xf32>,
    %c0_80 = arith.constant 0 : index
    %c0_81 = arith.constant 0 : index
    %80 = vector.load %arg6[%c0_80, %c0_81] : memref<16x32xf32, #tpu.memory_space<vmem>>, vector<16x32xf32>
    %81 = arith.truncf %80 : vector<16x32xf32> to vector<16x32xbf16>
    %c0_82 = arith.constant 0 : index
    %c0_83 = arith.constant 0 : index
    %82 = vector.load %arg2[%c0_82, %c0_83] : memref<192x512xbf16, #tpu.memory_space<vmem>>, vector<32x512xbf16>
    %c32 = arith.constant 32 : index
    %c0_84 = arith.constant 0 : index
    %83 = vector.load %arg2[%c32, %c0_84] : memref<192x512xbf16, #tpu.memory_space<vmem>>, vector<128x256xbf16>
    %c32_85 = arith.constant 32 : index
    %c256 = arith.constant 256 : index
    %84 = vector.load %arg2[%c32_85, %c256] : memref<192x512xbf16, #tpu.memory_space<vmem>>, vector<128x256xbf16>
    %c160 = arith.constant 160 : index
    %c0_86 = arith.constant 0 : index
    %85 = vector.load %arg2[%c160, %c0_86] : memref<192x512xbf16, #tpu.memory_space<vmem>>, vector<32x512xbf16>
    %c0_87 = arith.constant 0 : index
    %c0_88 = arith.constant 0 : index
    %86 = vector.load %arg4[%c0_87, %c0_88] : memref<3x512xf32, #tpu.memory_space<vmem>>, vector<1x512xf32>
    %c1_89 = arith.constant 1 : index
    %c0_90 = arith.constant 0 : index
    %87 = vector.load %arg4[%c1_89, %c0_90] : memref<3x512xf32, #tpu.memory_space<vmem>>, vector<1x512xf32>
    %c2_91 = arith.constant 2 : index
    %c0_92 = arith.constant 0 : index
    %88 = vector.load %arg4[%c2_91, %c0_92] : memref<3x512xf32, #tpu.memory_space<vmem>>, vector<1x128xf32>
    %cst = arith.constant dense<0.000000e+00> : vector<16x512xf32>
    %89 = tpu.matmul %81, %82, %cst {dimension_numbers = #tpu.dot_dimension_numbers<[1], [0], [0], [1], [0, 0, 1, 1], [], []>} : vector<16x32xbf16>, vector<32x512xbf16>, vector<16x512xf32> -> vector<16x512xf32>
    %90 = vector.broadcast %86 : vector<1x512xf32> to vector<16x512xf32>
    %91 = arith.addf %89, %90 : vector<16x512xf32>
    %92 = vector.extract_strided_slice %91 {offsets = [0, 0], sizes = [2, 512], strides = [1, 1]} : vector<16x512xf32> to vector<2x512xf32>
    %93 = vector.extract_strided_slice %92 {offsets = [0, 0], sizes = [2, 128], strides = [1, 1]} : vector<2x512xf32> to vector<2x128xf32>
    %cst_93 = arith.constant 5.000000e-01 : f32
    %94 = vector.broadcast %cst_93 : f32 to vector<2x128xf32>
    %95 = arith.mulf %94, %93 : vector<2x128xf32>
    %96 = math.tanh %95 : vector<2x128xf32>
    %cst_94 = arith.constant 5.000000e-01 : f32
    %97 = vector.broadcast %cst_94 : f32 to vector<2x128xf32>
    %98 = arith.mulf %97, %96 : vector<2x128xf32>
    %cst_95 = arith.constant 5.000000e-01 : f32
    %99 = vector.broadcast %cst_95 : f32 to vector<2x128xf32>
    %100 = arith.addf %98, %99 : vector<2x128xf32>
    %101 = vector.extract_strided_slice %92 {offsets = [0, 256], sizes = [2, 128], strides = [1, 1]} : vector<2x512xf32> to vector<2x128xf32>
    %102 = math.tanh %101 : vector<2x128xf32>
    %103 = vector.extract_strided_slice %92 {offsets = [0, 384], sizes = [2, 128], strides = [1, 1]} : vector<2x512xf32> to vector<2x128xf32>
    %cst_96 = arith.constant 5.000000e-01 : f32
    %104 = vector.broadcast %cst_96 : f32 to vector<2x128xf32>
    %105 = arith.mulf %104, %103 : vector<2x128xf32>
    %106 = math.tanh %105 : vector<2x128xf32>
    %cst_97 = arith.constant 5.000000e-01 : f32
    %107 = vector.broadcast %cst_97 : f32 to vector<2x128xf32>
    %108 = arith.mulf %107, %106 : vector<2x128xf32>
    %cst_98 = arith.constant 5.000000e-01 : f32
    %109 = vector.broadcast %cst_98 : f32 to vector<2x128xf32>
    %110 = arith.addf %108, %109 : vector<2x128xf32>
    %111 = arith.mulf %100, %102 : vector<2x128xf32>
    %112 = math.tanh %111 : vector<2x128xf32>
    %113 = arith.mulf %110, %112 : vector<2x128xf32>
    %114 = arith.truncf %113 : vector<2x128xf32> to vector<2x128xbf16>
    %115 = vector.extract_strided_slice %91 {offsets = [2, 0], sizes = [2, 512], strides = [1, 1]} : vector<16x512xf32> to vector<2x512xf32>
    %116 = vector.extract_strided_slice %115 {offsets = [0, 0], sizes = [2, 256], strides = [1, 1]} : vector<2x512xf32> to vector<2x256xf32>
    %cst_99 = arith.constant dense<0.000000e+00> : vector<2x256xf32>
    %117 = tpu.matmul %114, %83, %cst_99 {dimension_numbers = #tpu.dot_dimension_numbers<[1], [0], [0], [1], [0, 0, 1, 1], [], []>} : vector<2x128xbf16>, vector<128x256xbf16>, vector<2x256xf32> -> vector<2x256xf32>
    %118 = arith.addf %116, %117 : vector<2x256xf32>
    %119 = vector.extract_strided_slice %115 {offsets = [0, 256], sizes = [2, 256], strides = [1, 1]} : vector<2x512xf32> to vector<2x256xf32>
    %cst_100 = arith.constant dense<0.000000e+00> : vector<2x256xf32>
    %120 = tpu.matmul %114, %84, %cst_100 {dimension_numbers = #tpu.dot_dimension_numbers<[1], [0], [0], [1], [0, 0, 1, 1], [], []>} : vector<2x128xbf16>, vector<128x256xbf16>, vector<2x256xf32> -> vector<2x256xf32>
    %121 = arith.addf %119, %120 : vector<2x256xf32>
    %122 = vector.extract_strided_slice %118 {offsets = [0, 0], sizes = [2, 128], strides = [1, 1]} : vector<2x256xf32> to vector<2x128xf32>
    %cst_101 = arith.constant 5.000000e-01 : f32
    %123 = vector.broadcast %cst_101 : f32 to vector<2x128xf32>
    %124 = arith.mulf %123, %122 : vector<2x128xf32>
    %125 = math.tanh %124 : vector<2x128xf32>
    %cst_102 = arith.constant 5.000000e-01 : f32
    %126 = vector.broadcast %cst_102 : f32 to vector<2x128xf32>
    %127 = arith.mulf %126, %125 : vector<2x128xf32>
    %cst_103 = arith.constant 5.000000e-01 : f32
    %128 = vector.broadcast %cst_103 : f32 to vector<2x128xf32>
    %129 = arith.addf %127, %128 : vector<2x128xf32>
    %130 = vector.extract_strided_slice %118 {offsets = [0, 128], sizes = [2, 128], strides = [1, 1]} : vector<2x256xf32> to vector<2x128xf32>
    %cst_104 = arith.constant 5.000000e-01 : f32
    %131 = vector.broadcast %cst_104 : f32 to vector<2x128xf32>
    %132 = arith.mulf %131, %130 : vector<2x128xf32>
    %133 = math.tanh %132 : vector<2x128xf32>
    %cst_105 = arith.constant 5.000000e-01 : f32
    %134 = vector.broadcast %cst_105 : f32 to vector<2x128xf32>
    %135 = arith.mulf %134, %133 : vector<2x128xf32>
    %cst_106 = arith.constant 5.000000e-01 : f32
    %136 = vector.broadcast %cst_106 : f32 to vector<2x128xf32>
    %137 = arith.addf %135, %136 : vector<2x128xf32>
    %138 = vector.extract_strided_slice %121 {offsets = [0, 0], sizes = [2, 128], strides = [1, 1]} : vector<2x256xf32> to vector<2x128xf32>
    %139 = math.tanh %138 : vector<2x128xf32>
    %140 = vector.extract_strided_slice %121 {offsets = [0, 128], sizes = [2, 128], strides = [1, 1]} : vector<2x256xf32> to vector<2x128xf32>
    %cst_107 = arith.constant 5.000000e-01 : f32
    %141 = vector.broadcast %cst_107 : f32 to vector<2x128xf32>
    %142 = arith.mulf %141, %140 : vector<2x128xf32>
    %143 = math.tanh %142 : vector<2x128xf32>
    %cst_108 = arith.constant 5.000000e-01 : f32
    %144 = vector.broadcast %cst_108 : f32 to vector<2x128xf32>
    %145 = arith.mulf %144, %143 : vector<2x128xf32>
    %cst_109 = arith.constant 5.000000e-01 : f32
    %146 = vector.broadcast %cst_109 : f32 to vector<2x128xf32>
    %147 = arith.addf %145, %146 : vector<2x128xf32>
    %148 = arith.mulf %137, %111 : vector<2x128xf32>
    %149 = arith.mulf %129, %139 : vector<2x128xf32>
    %150 = arith.addf %148, %149 : vector<2x128xf32>
    %151 = math.tanh %150 : vector<2x128xf32>
    %152 = arith.mulf %147, %151 : vector<2x128xf32>
    %153 = arith.truncf %152 : vector<2x128xf32> to vector<2x128xbf16>
    %154 = vector.extract_strided_slice %91 {offsets = [4, 0], sizes = [2, 512], strides = [1, 1]} : vector<16x512xf32> to vector<2x512xf32>
    %155 = vector.extract_strided_slice %154 {offsets = [0, 0], sizes = [2, 256], strides = [1, 1]} : vector<2x512xf32> to vector<2x256xf32>
    %cst_110 = arith.constant dense<0.000000e+00> : vector<2x256xf32>
    %156 = tpu.matmul %153, %83, %cst_110 {dimension_numbers = #tpu.dot_dimension_numbers<[1], [0], [0], [1], [0, 0, 1, 1], [], []>} : vector<2x128xbf16>, vector<128x256xbf16>, vector<2x256xf32> -> vector<2x256xf32>
    %157 = arith.addf %155, %156 : vector<2x256xf32>
    %158 = vector.extract_strided_slice %154 {offsets = [0, 256], sizes = [2, 256], strides = [1, 1]} : vector<2x512xf32> to vector<2x256xf32>
    %cst_111 = arith.constant dense<0.000000e+00> : vector<2x256xf32>
    %159 = tpu.matmul %153, %84, %cst_111 {dimension_numbers = #tpu.dot_dimension_numbers<[1], [0], [0], [1], [0, 0, 1, 1], [], []>} : vector<2x128xbf16>, vector<128x256xbf16>, vector<2x256xf32> -> vector<2x256xf32>
    %160 = arith.addf %158, %159 : vector<2x256xf32>
    %161 = vector.extract_strided_slice %157 {offsets = [0, 0], sizes = [2, 128], strides = [1, 1]} : vector<2x256xf32> to vector<2x128xf32>
    %cst_112 = arith.constant 5.000000e-01 : f32
    %162 = vector.broadcast %cst_112 : f32 to vector<2x128xf32>
    %163 = arith.mulf %162, %161 : vector<2x128xf32>
    %164 = math.tanh %163 : vector<2x128xf32>
    %cst_113 = arith.constant 5.000000e-01 : f32
    %165 = vector.broadcast %cst_113 : f32 to vector<2x128xf32>
    %166 = arith.mulf %165, %164 : vector<2x128xf32>
    %cst_114 = arith.constant 5.000000e-01 : f32
    %167 = vector.broadcast %cst_114 : f32 to vector<2x128xf32>
    %168 = arith.addf %166, %167 : vector<2x128xf32>
    %169 = vector.extract_strided_slice %157 {offsets = [0, 128], sizes = [2, 128], strides = [1, 1]} : vector<2x256xf32> to vector<2x128xf32>
    %cst_115 = arith.constant 5.000000e-01 : f32
    %170 = vector.broadcast %cst_115 : f32 to vector<2x128xf32>
    %171 = arith.mulf %170, %169 : vector<2x128xf32>
    %172 = math.tanh %171 : vector<2x128xf32>
    %cst_116 = arith.constant 5.000000e-01 : f32
    %173 = vector.broadcast %cst_116 : f32 to vector<2x128xf32>
    %174 = arith.mulf %173, %172 : vector<2x128xf32>
    %cst_117 = arith.constant 5.000000e-01 : f32
    %175 = vector.broadcast %cst_117 : f32 to vector<2x128xf32>
    %176 = arith.addf %174, %175 : vector<2x128xf32>
    %177 = vector.extract_strided_slice %160 {offsets = [0, 0], sizes = [2, 128], strides = [1, 1]} : vector<2x256xf32> to vector<2x128xf32>
    %178 = math.tanh %177 : vector<2x128xf32>
    %179 = vector.extract_strided_slice %160 {offsets = [0, 128], sizes = [2, 128], strides = [1, 1]} : vector<2x256xf32> to vector<2x128xf32>
    %cst_118 = arith.constant 5.000000e-01 : f32
    %180 = vector.broadcast %cst_118 : f32 to vector<2x128xf32>
    %181 = arith.mulf %180, %179 : vector<2x128xf32>
    %182 = math.tanh %181 : vector<2x128xf32>
    %cst_119 = arith.constant 5.000000e-01 : f32
    %183 = vector.broadcast %cst_119 : f32 to vector<2x128xf32>
    %184 = arith.mulf %183, %182 : vector<2x128xf32>
    %cst_120 = arith.constant 5.000000e-01 : f32
    %185 = vector.broadcast %cst_120 : f32 to vector<2x128xf32>
    %186 = arith.addf %184, %185 : vector<2x128xf32>
    %187 = arith.mulf %176, %150 : vector<2x128xf32>
    %188 = arith.mulf %168, %178 : vector<2x128xf32>
    %189 = arith.addf %187, %188 : vector<2x128xf32>
    %190 = math.tanh %189 : vector<2x128xf32>
    %191 = arith.mulf %186, %190 : vector<2x128xf32>
    %192 = arith.truncf %191 : vector<2x128xf32> to vector<2x128xbf16>
    %193 = vector.extract_strided_slice %91 {offsets = [6, 0], sizes = [2, 512], strides = [1, 1]} : vector<16x512xf32> to vector<2x512xf32>
    %194 = vector.extract_strided_slice %193 {offsets = [0, 0], sizes = [2, 256], strides = [1, 1]} : vector<2x512xf32> to vector<2x256xf32>
    %cst_121 = arith.constant dense<0.000000e+00> : vector<2x256xf32>
    %195 = tpu.matmul %192, %83, %cst_121 {dimension_numbers = #tpu.dot_dimension_numbers<[1], [0], [0], [1], [0, 0, 1, 1], [], []>} : vector<2x128xbf16>, vector<128x256xbf16>, vector<2x256xf32> -> vector<2x256xf32>
    %196 = arith.addf %194, %195 : vector<2x256xf32>
    %197 = vector.extract_strided_slice %193 {offsets = [0, 256], sizes = [2, 256], strides = [1, 1]} : vector<2x512xf32> to vector<2x256xf32>
    %cst_122 = arith.constant dense<0.000000e+00> : vector<2x256xf32>
    %198 = tpu.matmul %192, %84, %cst_122 {dimension_numbers = #tpu.dot_dimension_numbers<[1], [0], [0], [1], [0, 0, 1, 1], [], []>} : vector<2x128xbf16>, vector<128x256xbf16>, vector<2x256xf32> -> vector<2x256xf32>
    %199 = arith.addf %197, %198 : vector<2x256xf32>
    %200 = vector.extract_strided_slice %196 {offsets = [0, 0], sizes = [2, 128], strides = [1, 1]} : vector<2x256xf32> to vector<2x128xf32>
    %cst_123 = arith.constant 5.000000e-01 : f32
    %201 = vector.broadcast %cst_123 : f32 to vector<2x128xf32>
    %202 = arith.mulf %201, %200 : vector<2x128xf32>
    %203 = math.tanh %202 : vector<2x128xf32>
    %cst_124 = arith.constant 5.000000e-01 : f32
    %204 = vector.broadcast %cst_124 : f32 to vector<2x128xf32>
    %205 = arith.mulf %204, %203 : vector<2x128xf32>
    %cst_125 = arith.constant 5.000000e-01 : f32
    %206 = vector.broadcast %cst_125 : f32 to vector<2x128xf32>
    %207 = arith.addf %205, %206 : vector<2x128xf32>
    %208 = vector.extract_strided_slice %196 {offsets = [0, 128], sizes = [2, 128], strides = [1, 1]} : vector<2x256xf32> to vector<2x128xf32>
    %cst_126 = arith.constant 5.000000e-01 : f32
    %209 = vector.broadcast %cst_126 : f32 to vector<2x128xf32>
    %210 = arith.mulf %209, %208 : vector<2x128xf32>
    %211 = math.tanh %210 : vector<2x128xf32>
    %cst_127 = arith.constant 5.000000e-01 : f32
    %212 = vector.broadcast %cst_127 : f32 to vector<2x128xf32>
    %213 = arith.mulf %212, %211 : vector<2x128xf32>
    %cst_128 = arith.constant 5.000000e-01 : f32
    %214 = vector.broadcast %cst_128 : f32 to vector<2x128xf32>
    %215 = arith.addf %213, %214 : vector<2x128xf32>
    %216 = vector.extract_strided_slice %199 {offsets = [0, 0], sizes = [2, 128], strides = [1, 1]} : vector<2x256xf32> to vector<2x128xf32>
    %217 = math.tanh %216 : vector<2x128xf32>
    %218 = vector.extract_strided_slice %199 {offsets = [0, 128], sizes = [2, 128], strides = [1, 1]} : vector<2x256xf32> to vector<2x128xf32>
    %cst_129 = arith.constant 5.000000e-01 : f32
    %219 = vector.broadcast %cst_129 : f32 to vector<2x128xf32>
    %220 = arith.mulf %219, %218 : vector<2x128xf32>
    %221 = math.tanh %220 : vector<2x128xf32>
    %cst_130 = arith.constant 5.000000e-01 : f32
    %222 = vector.broadcast %cst_130 : f32 to vector<2x128xf32>
    %223 = arith.mulf %222, %221 : vector<2x128xf32>
    %cst_131 = arith.constant 5.000000e-01 : f32
    %224 = vector.broadcast %cst_131 : f32 to vector<2x128xf32>
    %225 = arith.addf %223, %224 : vector<2x128xf32>
    %226 = arith.mulf %215, %189 : vector<2x128xf32>
    %227 = arith.mulf %207, %217 : vector<2x128xf32>
    %228 = arith.addf %226, %227 : vector<2x128xf32>
    %229 = math.tanh %228 : vector<2x128xf32>
    %230 = arith.mulf %225, %229 : vector<2x128xf32>
    %231 = arith.truncf %230 : vector<2x128xf32> to vector<2x128xbf16>
    %232 = vector.extract_strided_slice %91 {offsets = [8, 0], sizes = [2, 512], strides = [1, 1]} : vector<16x512xf32> to vector<2x512xf32>
    %233 = vector.extract_strided_slice %232 {offsets = [0, 0], sizes = [2, 256], strides = [1, 1]} : vector<2x512xf32> to vector<2x256xf32>
    %cst_132 = arith.constant dense<0.000000e+00> : vector<2x256xf32>
    %234 = tpu.matmul %231, %83, %cst_132 {dimension_numbers = #tpu.dot_dimension_numbers<[1], [0], [0], [1], [0, 0, 1, 1], [], []>} : vector<2x128xbf16>, vector<128x256xbf16>, vector<2x256xf32> -> vector<2x256xf32>
    %235 = arith.addf %233, %234 : vector<2x256xf32>
    %236 = vector.extract_strided_slice %232 {offsets = [0, 256], sizes = [2, 256], strides = [1, 1]} : vector<2x512xf32> to vector<2x256xf32>
    %cst_133 = arith.constant dense<0.000000e+00> : vector<2x256xf32>
    %237 = tpu.matmul %231, %84, %cst_133 {dimension_numbers = #tpu.dot_dimension_numbers<[1], [0], [0], [1], [0, 0, 1, 1], [], []>} : vector<2x128xbf16>, vector<128x256xbf16>, vector<2x256xf32> -> vector<2x256xf32>
    %238 = arith.addf %236, %237 : vector<2x256xf32>
    %239 = vector.extract_strided_slice %235 {offsets = [0, 0], sizes = [2, 128], strides = [1, 1]} : vector<2x256xf32> to vector<2x128xf32>
    %cst_134 = arith.constant 5.000000e-01 : f32
    %240 = vector.broadcast %cst_134 : f32 to vector<2x128xf32>
    %241 = arith.mulf %240, %239 : vector<2x128xf32>
    %242 = math.tanh %241 : vector<2x128xf32>
    %cst_135 = arith.constant 5.000000e-01 : f32
    %243 = vector.broadcast %cst_135 : f32 to vector<2x128xf32>
    %244 = arith.mulf %243, %242 : vector<2x128xf32>
    %cst_136 = arith.constant 5.000000e-01 : f32
    %245 = vector.broadcast %cst_136 : f32 to vector<2x128xf32>
    %246 = arith.addf %244, %245 : vector<2x128xf32>
    %247 = vector.extract_strided_slice %235 {offsets = [0, 128], sizes = [2, 128], strides = [1, 1]} : vector<2x256xf32> to vector<2x128xf32>
    %cst_137 = arith.constant 5.000000e-01 : f32
    %248 = vector.broadcast %cst_137 : f32 to vector<2x128xf32>
    %249 = arith.mulf %248, %247 : vector<2x128xf32>
    %250 = math.tanh %249 : vector<2x128xf32>
    %cst_138 = arith.constant 5.000000e-01 : f32
    %251 = vector.broadcast %cst_138 : f32 to vector<2x128xf32>
    %252 = arith.mulf %251, %250 : vector<2x128xf32>
    %cst_139 = arith.constant 5.000000e-01 : f32
    %253 = vector.broadcast %cst_139 : f32 to vector<2x128xf32>
    %254 = arith.addf %252, %253 : vector<2x128xf32>
    %255 = vector.extract_strided_slice %238 {offsets = [0, 0], sizes = [2, 128], strides = [1, 1]} : vector<2x256xf32> to vector<2x128xf32>
    %256 = math.tanh %255 : vector<2x128xf32>
    %257 = vector.extract_strided_slice %238 {offsets = [0, 128], sizes = [2, 128], strides = [1, 1]} : vector<2x256xf32> to vector<2x128xf32>
    %cst_140 = arith.constant 5.000000e-01 : f32
    %258 = vector.broadcast %cst_140 : f32 to vector<2x128xf32>
    %259 = arith.mulf %258, %257 : vector<2x128xf32>
    %260 = math.tanh %259 : vector<2x128xf32>
    %cst_141 = arith.constant 5.000000e-01 : f32
    %261 = vector.broadcast %cst_141 : f32 to vector<2x128xf32>
    %262 = arith.mulf %261, %260 : vector<2x128xf32>
    %cst_142 = arith.constant 5.000000e-01 : f32
    %263 = vector.broadcast %cst_142 : f32 to vector<2x128xf32>
    %264 = arith.addf %262, %263 : vector<2x128xf32>
    %265 = arith.mulf %254, %228 : vector<2x128xf32>
    %266 = arith.mulf %246, %256 : vector<2x128xf32>
    %267 = arith.addf %265, %266 : vector<2x128xf32>
    %268 = math.tanh %267 : vector<2x128xf32>
    %269 = arith.mulf %264, %268 : vector<2x128xf32>
    %270 = arith.truncf %269 : vector<2x128xf32> to vector<2x128xbf16>
    %271 = vector.extract_strided_slice %91 {offsets = [10, 0], sizes = [2, 512], strides = [1, 1]} : vector<16x512xf32> to vector<2x512xf32>
    %272 = vector.extract_strided_slice %271 {offsets = [0, 0], sizes = [2, 256], strides = [1, 1]} : vector<2x512xf32> to vector<2x256xf32>
    %cst_143 = arith.constant dense<0.000000e+00> : vector<2x256xf32>
    %273 = tpu.matmul %270, %83, %cst_143 {dimension_numbers = #tpu.dot_dimension_numbers<[1], [0], [0], [1], [0, 0, 1, 1], [], []>} : vector<2x128xbf16>, vector<128x256xbf16>, vector<2x256xf32> -> vector<2x256xf32>
    %274 = arith.addf %272, %273 : vector<2x256xf32>
    %275 = vector.extract_strided_slice %271 {offsets = [0, 256], sizes = [2, 256], strides = [1, 1]} : vector<2x512xf32> to vector<2x256xf32>
    %cst_144 = arith.constant dense<0.000000e+00> : vector<2x256xf32>
    %276 = tpu.matmul %270, %84, %cst_144 {dimension_numbers = #tpu.dot_dimension_numbers<[1], [0], [0], [1], [0, 0, 1, 1], [], []>} : vector<2x128xbf16>, vector<128x256xbf16>, vector<2x256xf32> -> vector<2x256xf32>
    %277 = arith.addf %275, %276 : vector<2x256xf32>
    %278 = vector.extract_strided_slice %274 {offsets = [0, 0], sizes = [2, 128], strides = [1, 1]} : vector<2x256xf32> to vector<2x128xf32>
    %cst_145 = arith.constant 5.000000e-01 : f32
    %279 = vector.broadcast %cst_145 : f32 to vector<2x128xf32>
    %280 = arith.mulf %279, %278 : vector<2x128xf32>
    %281 = math.tanh %280 : vector<2x128xf32>
    %cst_146 = arith.constant 5.000000e-01 : f32
    %282 = vector.broadcast %cst_146 : f32 to vector<2x128xf32>
    %283 = arith.mulf %282, %281 : vector<2x128xf32>
    %cst_147 = arith.constant 5.000000e-01 : f32
    %284 = vector.broadcast %cst_147 : f32 to vector<2x128xf32>
    %285 = arith.addf %283, %284 : vector<2x128xf32>
    %286 = vector.extract_strided_slice %274 {offsets = [0, 128], sizes = [2, 128], strides = [1, 1]} : vector<2x256xf32> to vector<2x128xf32>
    %cst_148 = arith.constant 5.000000e-01 : f32
    %287 = vector.broadcast %cst_148 : f32 to vector<2x128xf32>
    %288 = arith.mulf %287, %286 : vector<2x128xf32>
    %289 = math.tanh %288 : vector<2x128xf32>
    %cst_149 = arith.constant 5.000000e-01 : f32
    %290 = vector.broadcast %cst_149 : f32 to vector<2x128xf32>
    %291 = arith.mulf %290, %289 : vector<2x128xf32>
    %cst_150 = arith.constant 5.000000e-01 : f32
    %292 = vector.broadcast %cst_150 : f32 to vector<2x128xf32>
    %293 = arith.addf %291, %292 : vector<2x128xf32>
    %294 = vector.extract_strided_slice %277 {offsets = [0, 0], sizes = [2, 128], strides = [1, 1]} : vector<2x256xf32> to vector<2x128xf32>
    %295 = math.tanh %294 : vector<2x128xf32>
    %296 = vector.extract_strided_slice %277 {offsets = [0, 128], sizes = [2, 128], strides = [1, 1]} : vector<2x256xf32> to vector<2x128xf32>
    %cst_151 = arith.constant 5.000000e-01 : f32
    %297 = vector.broadcast %cst_151 : f32 to vector<2x128xf32>
    %298 = arith.mulf %297, %296 : vector<2x128xf32>
    %299 = math.tanh %298 : vector<2x128xf32>
    %cst_152 = arith.constant 5.000000e-01 : f32
    %300 = vector.broadcast %cst_152 : f32 to vector<2x128xf32>
    %301 = arith.mulf %300, %299 : vector<2x128xf32>
    %cst_153 = arith.constant 5.000000e-01 : f32
    %302 = vector.broadcast %cst_153 : f32 to vector<2x128xf32>
    %303 = arith.addf %301, %302 : vector<2x128xf32>
    %304 = arith.mulf %293, %267 : vector<2x128xf32>
    %305 = arith.mulf %285, %295 : vector<2x128xf32>
    %306 = arith.addf %304, %305 : vector<2x128xf32>
    %307 = math.tanh %306 : vector<2x128xf32>
    %308 = arith.mulf %303, %307 : vector<2x128xf32>
    %309 = arith.truncf %308 : vector<2x128xf32> to vector<2x128xbf16>
    %310 = vector.extract_strided_slice %91 {offsets = [12, 0], sizes = [2, 512], strides = [1, 1]} : vector<16x512xf32> to vector<2x512xf32>
    %311 = vector.extract_strided_slice %310 {offsets = [0, 0], sizes = [2, 256], strides = [1, 1]} : vector<2x512xf32> to vector<2x256xf32>
    %cst_154 = arith.constant dense<0.000000e+00> : vector<2x256xf32>
    %312 = tpu.matmul %309, %83, %cst_154 {dimension_numbers = #tpu.dot_dimension_numbers<[1], [0], [0], [1], [0, 0, 1, 1], [], []>} : vector<2x128xbf16>, vector<128x256xbf16>, vector<2x256xf32> -> vector<2x256xf32>
    %313 = arith.addf %311, %312 : vector<2x256xf32>
    %314 = vector.extract_strided_slice %310 {offsets = [0, 256], sizes = [2, 256], strides = [1, 1]} : vector<2x512xf32> to vector<2x256xf32>
    %cst_155 = arith.constant dense<0.000000e+00> : vector<2x256xf32>
    %315 = tpu.matmul %309, %84, %cst_155 {dimension_numbers = #tpu.dot_dimension_numbers<[1], [0], [0], [1], [0, 0, 1, 1], [], []>} : vector<2x128xbf16>, vector<128x256xbf16>, vector<2x256xf32> -> vector<2x256xf32>
    %316 = arith.addf %314, %315 : vector<2x256xf32>
    %317 = vector.extract_strided_slice %313 {offsets = [0, 0], sizes = [2, 128], strides = [1, 1]} : vector<2x256xf32> to vector<2x128xf32>
    %cst_156 = arith.constant 5.000000e-01 : f32
    %318 = vector.broadcast %cst_156 : f32 to vector<2x128xf32>
    %319 = arith.mulf %318, %317 : vector<2x128xf32>
    %320 = math.tanh %319 : vector<2x128xf32>
    %cst_157 = arith.constant 5.000000e-01 : f32
    %321 = vector.broadcast %cst_157 : f32 to vector<2x128xf32>
    %322 = arith.mulf %321, %320 : vector<2x128xf32>
    %cst_158 = arith.constant 5.000000e-01 : f32
    %323 = vector.broadcast %cst_158 : f32 to vector<2x128xf32>
    %324 = arith.addf %322, %323 : vector<2x128xf32>
    %325 = vector.extract_strided_slice %313 {offsets = [0, 128], sizes = [2, 128], strides = [1, 1]} : vector<2x256xf32> to vector<2x128xf32>
    %cst_159 = arith.constant 5.000000e-01 : f32
    %326 = vector.broadcast %cst_159 : f32 to vector<2x128xf32>
    %327 = arith.mulf %326, %325 : vector<2x128xf32>
    %328 = math.tanh %327 : vector<2x128xf32>
    %cst_160 = arith.constant 5.000000e-01 : f32
    %329 = vector.broadcast %cst_160 : f32 to vector<2x128xf32>
    %330 = arith.mulf %329, %328 : vector<2x128xf32>
    %cst_161 = arith.constant 5.000000e-01 : f32
    %331 = vector.broadcast %cst_161 : f32 to vector<2x128xf32>
    %332 = arith.addf %330, %331 : vector<2x128xf32>
    %333 = vector.extract_strided_slice %316 {offsets = [0, 0], sizes = [2, 128], strides = [1, 1]} : vector<2x256xf32> to vector<2x128xf32>
    %334 = math.tanh %333 : vector<2x128xf32>
    %335 = vector.extract_strided_slice %316 {offsets = [0, 128], sizes = [2, 128], strides = [1, 1]} : vector<2x256xf32> to vector<2x128xf32>
    %cst_162 = arith.constant 5.000000e-01 : f32
    %336 = vector.broadcast %cst_162 : f32 to vector<2x128xf32>
    %337 = arith.mulf %336, %335 : vector<2x128xf32>
    %338 = math.tanh %337 : vector<2x128xf32>
    %cst_163 = arith.constant 5.000000e-01 : f32
    %339 = vector.broadcast %cst_163 : f32 to vector<2x128xf32>
    %340 = arith.mulf %339, %338 : vector<2x128xf32>
    %cst_164 = arith.constant 5.000000e-01 : f32
    %341 = vector.broadcast %cst_164 : f32 to vector<2x128xf32>
    %342 = arith.addf %340, %341 : vector<2x128xf32>
    %343 = arith.mulf %332, %306 : vector<2x128xf32>
    %344 = arith.mulf %324, %334 : vector<2x128xf32>
    %345 = arith.addf %343, %344 : vector<2x128xf32>
    %346 = math.tanh %345 : vector<2x128xf32>
    %347 = arith.mulf %342, %346 : vector<2x128xf32>
    %348 = arith.truncf %347 : vector<2x128xf32> to vector<2x128xbf16>
    %349 = vector.extract_strided_slice %91 {offsets = [14, 0], sizes = [2, 512], strides = [1, 1]} : vector<16x512xf32> to vector<2x512xf32>
    %350 = vector.extract_strided_slice %349 {offsets = [0, 0], sizes = [2, 256], strides = [1, 1]} : vector<2x512xf32> to vector<2x256xf32>
    %cst_165 = arith.constant dense<0.000000e+00> : vector<2x256xf32>
    %351 = tpu.matmul %348, %83, %cst_165 {dimension_numbers = #tpu.dot_dimension_numbers<[1], [0], [0], [1], [0, 0, 1, 1], [], []>} : vector<2x128xbf16>, vector<128x256xbf16>, vector<2x256xf32> -> vector<2x256xf32>
    %352 = arith.addf %350, %351 : vector<2x256xf32>
    %353 = vector.extract_strided_slice %349 {offsets = [0, 256], sizes = [2, 256], strides = [1, 1]} : vector<2x512xf32> to vector<2x256xf32>
    %cst_166 = arith.constant dense<0.000000e+00> : vector<2x256xf32>
    %354 = tpu.matmul %348, %84, %cst_166 {dimension_numbers = #tpu.dot_dimension_numbers<[1], [0], [0], [1], [0, 0, 1, 1], [], []>} : vector<2x128xbf16>, vector<128x256xbf16>, vector<2x256xf32> -> vector<2x256xf32>
    %355 = arith.addf %353, %354 : vector<2x256xf32>
    %356 = vector.extract_strided_slice %352 {offsets = [0, 0], sizes = [2, 128], strides = [1, 1]} : vector<2x256xf32> to vector<2x128xf32>
    %cst_167 = arith.constant 5.000000e-01 : f32
    %357 = vector.broadcast %cst_167 : f32 to vector<2x128xf32>
    %358 = arith.mulf %357, %356 : vector<2x128xf32>
    %359 = math.tanh %358 : vector<2x128xf32>
    %cst_168 = arith.constant 5.000000e-01 : f32
    %360 = vector.broadcast %cst_168 : f32 to vector<2x128xf32>
    %361 = arith.mulf %360, %359 : vector<2x128xf32>
    %cst_169 = arith.constant 5.000000e-01 : f32
    %362 = vector.broadcast %cst_169 : f32 to vector<2x128xf32>
    %363 = arith.addf %361, %362 : vector<2x128xf32>
    %364 = vector.extract_strided_slice %352 {offsets = [0, 128], sizes = [2, 128], strides = [1, 1]} : vector<2x256xf32> to vector<2x128xf32>
    %cst_170 = arith.constant 5.000000e-01 : f32
    %365 = vector.broadcast %cst_170 : f32 to vector<2x128xf32>
    %366 = arith.mulf %365, %364 : vector<2x128xf32>
    %367 = math.tanh %366 : vector<2x128xf32>
    %cst_171 = arith.constant 5.000000e-01 : f32
    %368 = vector.broadcast %cst_171 : f32 to vector<2x128xf32>
    %369 = arith.mulf %368, %367 : vector<2x128xf32>
    %cst_172 = arith.constant 5.000000e-01 : f32
    %370 = vector.broadcast %cst_172 : f32 to vector<2x128xf32>
    %371 = arith.addf %369, %370 : vector<2x128xf32>
    %372 = vector.extract_strided_slice %355 {offsets = [0, 0], sizes = [2, 128], strides = [1, 1]} : vector<2x256xf32> to vector<2x128xf32>
    %373 = math.tanh %372 : vector<2x128xf32>
    %374 = vector.extract_strided_slice %355 {offsets = [0, 128], sizes = [2, 128], strides = [1, 1]} : vector<2x256xf32> to vector<2x128xf32>
    %cst_173 = arith.constant 5.000000e-01 : f32
    %375 = vector.broadcast %cst_173 : f32 to vector<2x128xf32>
    %376 = arith.mulf %375, %374 : vector<2x128xf32>
    %377 = math.tanh %376 : vector<2x128xf32>
    %cst_174 = arith.constant 5.000000e-01 : f32
    %378 = vector.broadcast %cst_174 : f32 to vector<2x128xf32>
    %379 = arith.mulf %378, %377 : vector<2x128xf32>
    %cst_175 = arith.constant 5.000000e-01 : f32
    %380 = vector.broadcast %cst_175 : f32 to vector<2x128xf32>
    %381 = arith.addf %379, %380 : vector<2x128xf32>
    %382 = arith.mulf %371, %345 : vector<2x128xf32>
    %383 = arith.mulf %363, %373 : vector<2x128xf32>
    %384 = arith.addf %382, %383 : vector<2x128xf32>
    %385 = math.tanh %384 : vector<2x128xf32>
    %386 = arith.mulf %381, %385 : vector<2x128xf32>
    %387 = vector.extract_strided_slice %81 {offsets = [14, 0], sizes = [2, 32], strides = [1, 1]} : vector<16x32xbf16> to vector<2x32xbf16>
    %cst_176 = arith.constant dense<0.000000e+00> : vector<2x512xf32>
    %388 = tpu.matmul %387, %85, %cst_176 {dimension_numbers = #tpu.dot_dimension_numbers<[1], [0], [0], [1], [0, 0, 1, 1], [], []>} : vector<2x32xbf16>, vector<32x512xbf16>, vector<2x512xf32> -> vector<2x512xf32>
    %389 = vector.broadcast %87 : vector<1x512xf32> to vector<2x512xf32>
    %390 = arith.addf %388, %389 : vector<2x512xf32>
    %391 = vector.extract_strided_slice %390 {offsets = [0, 0], sizes = [2, 128], strides = [1, 1]} : vector<2x512xf32> to vector<2x128xf32>
    %cst_177 = arith.constant 5.000000e-01 : f32
    %392 = vector.broadcast %cst_177 : f32 to vector<2x128xf32>
    %393 = arith.mulf %392, %391 : vector<2x128xf32>
    %394 = math.tanh %393 : vector<2x128xf32>
    %cst_178 = arith.constant 5.000000e-01 : f32
    %395 = vector.broadcast %cst_178 : f32 to vector<2x128xf32>
    %396 = arith.mulf %395, %394 : vector<2x128xf32>
    %cst_179 = arith.constant 5.000000e-01 : f32
    %397 = vector.broadcast %cst_179 : f32 to vector<2x128xf32>
    %398 = arith.addf %396, %397 : vector<2x128xf32>
    %399 = vector.extract_strided_slice %390 {offsets = [0, 256], sizes = [2, 128], strides = [1, 1]} : vector<2x512xf32> to vector<2x128xf32>
    %400 = math.tanh %399 : vector<2x128xf32>
    %401 = vector.extract_strided_slice %390 {offsets = [0, 384], sizes = [2, 128], strides = [1, 1]} : vector<2x512xf32> to vector<2x128xf32>
    %cst_180 = arith.constant 5.000000e-01 : f32
    %402 = vector.broadcast %cst_180 : f32 to vector<2x128xf32>
    %403 = arith.mulf %402, %401 : vector<2x128xf32>
    %404 = math.tanh %403 : vector<2x128xf32>
    %cst_181 = arith.constant 5.000000e-01 : f32
    %405 = vector.broadcast %cst_181 : f32 to vector<2x128xf32>
    %406 = arith.mulf %405, %404 : vector<2x128xf32>
    %cst_182 = arith.constant 5.000000e-01 : f32
    %407 = vector.broadcast %cst_182 : f32 to vector<2x128xf32>
    %408 = arith.addf %406, %407 : vector<2x128xf32>
    %409 = arith.mulf %398, %400 : vector<2x128xf32>
    %410 = math.tanh %409 : vector<2x128xf32>
    %411 = arith.mulf %408, %410 : vector<2x128xf32>
    %412 = tpu.concatenate %386, %411 in 1 : vector<2x128xf32>, vector<2x128xf32> -> vector<2x256xf32>
    %413 = arith.truncf %412 : vector<2x256xf32> to vector<2x256xbf16>
    %c0_183 = arith.constant 0 : index
    %c0_184 = arith.constant 0 : index
    %414 = vector.load %arg3[%c0_183, %c0_184] : memref<256x128xbf16, #tpu.memory_space<vmem>>, vector<256x128xbf16>
    %cst_185 = arith.constant dense<0.000000e+00> : vector<2x128xf32>
    %415 = tpu.matmul %413, %414, %cst_185 {dimension_numbers = #tpu.dot_dimension_numbers<[1], [0], [0], [1], [0, 0, 1, 1], [], []>} : vector<2x256xbf16>, vector<256x128xbf16>, vector<2x128xf32> -> vector<2x128xf32>
    %416 = vector.broadcast %88 : vector<1x128xf32> to vector<2x128xf32>
    %417 = arith.addf %415, %416 : vector<2x128xf32>
    %418 = vector.extract_strided_slice %417 {offsets = [0, 0], sizes = [2, 50], strides = [1, 1]} : vector<2x128xf32> to vector<2x50xf32>
    %c0_186 = arith.constant 0 : index
    %c0_187 = arith.constant 0 : index
    %419 = vector.load %arg5[%c0_186, %c0_187] : memref<2x50xf32, #tpu.memory_space<vmem>>, vector<2x50xf32>
    tpu.vector_store %arg5[%c0_186, %c0_187], %418 {strides = array<i32>} : memref<2x50xf32, #tpu.memory_space<vmem>>, vector<2x50xf32>,
    return
  }
}

</mosaic_0001>

<bundles_post_ra>
// kernel: text_generation_forward.1
= control target key start
LH: loop header
LB: loop body
LE: loop exit
PB: predicated region body
PF: predicated region fallthrough
CT: control target
= control target key end

     0   :  { %10 = vsyncpa [#allocation6], 0  ;;  %s2675_s0 = inlined_call_operand.vmem [shape: s32[2,8], index: 0, kind: input, shape index: {}]   ;;  %s2676_s1 = inlined_call_operand.vmem [shape: f32[50,1,32], index: 1, kind: input, shape index: {}]   ;;  %s2677_s2 = inlined_call_operand.hbm [shape: bf16[192,512], index: 2, kind: input, shape index: {}]   ;;  %s2678_s3 = inlined_call_operand.hbm [shape: bf16[256,128], index: 3, kind: input, shape index: {}]   ;;  %s2679_s4 = inlined_call_operand.vmem [shape: f32[3,512], index: 4, kind: input, shape index: {}]   ;;  %s2680_s5 = inlined_call_operand.hbm [shape: f32[2,50], index: 5, kind: output, shape index: {}]  }
   0x1   :  { %11 = vsyncpa [#allocation4], 0 }
   0x2   :  { %12 = vsyncpa [#allocation9], 0 }
   0x3   :  { %13 = vsyncpa [#allocation5], 0  ;;  %s20_s20 = sshll.u32 %s2675_s0, 4  ;;  %s21_s20 = int_to_ptr.vmem [resolvable:$true] %s20_s20 }
   0x4   :  { %s2011_s21 = scalar_lea.vmem %s21_s20, 32  ;;  %p2016_p1 = scmp.lt.s32.totalorder %s21_s20, %s21_s20 }
   0x5   :  { %p2012_p0 = scmp.ne.s32.totalorder %s21_s20, %s2011_s21  ;;  %p2017_p2 = scmp.lt.s32.totalorder %s2011_s21, %s2011_s21 }
   0x7   :  { %p2018_p3 = por %p2017_p2, %p2016_p1 }
   0x9   :  { %p2019_p4 = pnand %p2018_p3, %p2012_p0 }
   0xb   :  { %2022 = shalt.err (!%p2019_p4)
}
   0xc   :  { %s2097_s22 = smov [#allocation3]   ;;  %s2098_s23 = smov [#allocation7]  }
   0xd   :  { %23 = dma.vmem_to_smem %s21_s20, 32, %s2097_s22, [#allocation6]  }
   0xe   :  { %s31_s24 = sshll.u32 %s2098_s23, 4  ;;  %s2023_s27 = scalar_lea.hbm %s2677_s2, 6144  ;;  %s32_s24 = int_to_ptr.vmem [resolvable:$true] %s31_s24 }
   0xf   :  { %p2024_p5 = scmp.ne.s32.totalorder %s2677_s2, %s2023_s27  ;;  %p2027_p6 = scmp.lt.u32.totalorder %s2023_s27, %s2677_s2 }
  0x11   :  { %p2029_p7 = pnand %p2027_p6, %p2024_p5 }
  0x13   :  { %2032 = shalt.err (!%p2029_p7)
}
  0x14   :  { %s2033_s6 = scalar_lea.vmem %s32_s24, 6144  ;;  %p2038_p9 = scmp.lt.s32.totalorder %s32_s24, %s32_s24 }
  0x15   :  { %p2034_p8 = scmp.ne.s32.totalorder %s32_s24, %s2033_s6  ;;  %p2039_p10 = scmp.lt.s32.totalorder %s2033_s6, %s2033_s6 }
  0x17   :  { %p2040_p11 = por %p2039_p10, %p2038_p9 }
  0x19   :  { %p2041_p12 = pnand %p2040_p11, %p2034_p8 }
  0x1b   :  { %2044 = shalt.err (!%p2041_p12)
}
  0x1c   :  { %s2099_s7 = smov 256   ;;  %s2100_s8 = smov 16  }
  0x1d   :  { %37 = dma.hbm_to_vmem [thread:$0]  %s2677_s2, 6144, %s32_s24, [#allocation4], %s2099_s7, %s2099_s7, %s2100_s8  }
  0x1e   :  { %s2101_s11 = smov [#allocation8]   ;;  %s2045_s15 = scalar_lea.hbm %s2678_s3, 2048 }
  0x1f   :  { %s43_s12 = sshll.u32 %s2101_s11, 4  ;;  %p2046_p13 = scmp.ne.s32.totalorder %s2678_s3, %s2045_s15  ;;  %s44_s12 = int_to_ptr.vmem [resolvable:$true] %s43_s12 }
  0x20   :  { %p2049_p0 = scmp.lt.u32.totalorder %s2045_s15, %s2678_s3 }
  0x22   :  { %p2051_p1 = pnand %p2049_p0, %p2046_p13 }
  0x24   :  { %2054 = shalt.err (!%p2051_p1)
}
  0x25   :  { %s2055_s20 = scalar_lea.vmem %s44_s12, 2048  ;;  %p2060_p3 = scmp.lt.s32.totalorder %s44_s12, %s44_s12 }
  0x26   :  { %p2056_p2 = scmp.ne.s32.totalorder %s44_s12, %s2055_s20  ;;  %p2061_p4 = scmp.lt.s32.totalorder %s2055_s20, %s2055_s20 }
  0x28   :  { %p2062_p5 = por %p2061_p4, %p2060_p3 }
  0x2a   :  { %p2063_p6 = pnand %p2062_p5, %p2056_p2 }
  0x2c   :  { %2066 = shalt.err (!%p2063_p6)
}
  0x2d   :  { %s2102_s2 = smov 64   ;;  %s2103_s21 = smov 4  }
  0x2e   :  { %49 = dma.hbm_to_vmem [thread:$0]  %s2678_s3, 2048, %s44_s12, [#allocation9], %s2102_s2, %s2102_s2, %s2103_s21  }
  0x2f   :  { %2089 = dma.done.wait [#allocation6], 32  }
  0x30   :  { %2090 = vsyncadd [#allocation6], 4294967264 }
  0x31   :  { %2091 = dma.done.wait [#allocation4], 6144  }
  0x32   :  { %2092 = vsyncadd [#allocation4], 4294961152 }
  0x33   :  { %2093 = dma.done.wait [#allocation9], 2048  }
  0x34   :  { %2094 = vsyncadd [#allocation9], 4294965248 }
  0x35   :  { %61 = sfence }
  0x36   :  { %v1837_v0 = vld [vmem:[#allocation7 + $0x4] ss:$16 sps:$4 sm:$0xff]   ;;  %v1839_v1 = vld [vmem:[#allocation7] ss:$16 sps:$4 sm:$0xff]   ;;  %v2104_v2 = vmov 0   ;;  %s63_s24 = sld [smem:[#allocation3]]  ;;  %v184_v60 = vlaneseq }
  0x37   :  { %280 = vmatprep.mubr.bf16.mxu1 %v2104_v2  ;;  %459 = vmatprep.mubr.bf16.mxu0 %v2104_v2  ;;  %v1840_v3 = vld [vmem:[#allocation7 + $0x24] ss:$16 sps:$4 sm:$0xff]   ;;  %v1842_v4 = vld [vmem:[#allocation7 + $0x20] ss:$16 sps:$4 sm:$0xff]   ;;  %v1845_v5 = vld [vmem:[#allocation7 + $0xc] ss:$16 sps:$4 sm:$0xff]  }
  0x38   :  { %248 = vmatprep.subr.bf16.mxu1 %v1837_v0  ;;  %s1721_s3 = sld [smem:[#allocation3 + $0x80]]  ;;  %s1722_s25 = sld [smem:[#allocation3 + $0x1]]  ;;  %vm66_vm0 = vcmask 253952   ;;  %v1843_v23 = vld [vmem:[#allocation7 + $0x8] ss:$16 sps:$4 sm:$0xff]   ;;  %vm244_vm1 = vcmask 261120  }
  0x39   :  { %249 = vmatpush1.bf16.msra.mxu1 %v1839_v1  ;;  %s1723_s26 = sld [smem:[#allocation3 + $0x81]]  ;;  %s1724_s27 = sld [smem:[#allocation3 + $0x2]]  ;;  %v1848_v24 = vld [vmem:[#allocation7 + $0x2c] ss:$16 sps:$4 sm:$0xff]   ;;  %v1846_v27 = vld [vmem:[#allocation7 + $0x28] ss:$16 sps:$4 sm:$0xff]  }
  0x3a   :  { %250 = vmatprep.subr.bf16.mxu1 %v1840_v3  ;;  %s1725_s28 = sld [smem:[#allocation3 + $0x82]]  ;;  %s1726_s29 = sld [smem:[#allocation3 + $0x3]]  ;;  %v2249_v28 = vld [vmem:[#allocation7 + $0x44] ss:$16 sps:$4 sm:$0xff]   ;;  %v2251_v29 = vld [vmem:[#allocation7 + $0x4c] ss:$16 sps:$4 sm:$0xff]  }
  0x3b   :  { %s1727_s7 = sld [smem:[#allocation3 + $0x83]]  ;;  %s2168_s8 = sld [smem:[#allocation3 + $0x4]]  ;;  %v2253_v30 = vld [vmem:[#allocation7 + $0x40] ss:$16 sps:$4 sm:$0xff]   ;;  %v2255_v31 = vld [vmem:[#allocation7 + $0x48] ss:$16 sps:$4 sm:$0xff]   ;;  %427 = vmatprep.subr.bf16.mxu0 %v2249_v28 }
  0x3c   :  { %s64_s6 = scalar_lea.vmem %s2676_s1, %s63_s24  ;;  %s2170_s9 = sld [smem:[#allocation3 + $0x84]]  ;;  %428 = vmatpush1.bf16.msra.mxu0 %v2253_v30  ;;  %v2261_v32 = vld [vmem:[#allocation7 + $0x64] ss:$16 sps:$4 sm:$0xff]   ;;  %v2263_v33 = vld [vmem:[#allocation7 + $0x6c] ss:$16 sps:$4 sm:$0xff]   ;;  %v2347_v61 = vshrl.u32 %v184_v60, 7 }
  0x3d   :  { %251 = vmatpush1.bf16.msra.mxu1 %v1842_v4  ;;  %v65_v6 = vld [vmem:[%s64_s6] sm:$0x1]  ;;  %s2173_s10 = sld [smem:[#allocation3 + $0x5]]  ;;  %s1732_s12 = sld [smem:[#allocation3 + $0x6]]  ;;  %v2267_v35 = vld [vmem:[#allocation7 + $0x68] ss:$16 sps:$4 sm:$0xff]   ;;  %429 = vmatprep.subr.bf16.mxu0 %v2261_v32 }
  0x3e   :  { %291 = vmatprep.subr.bf16.mxu1 %v1845_v5  ;;  %67 = vst.msk [vmem:[#allocation2] sm:$0x1] %vm66_vm0, %v65_v6  ;;  %s2175_s11 = sld [smem:[#allocation3 + $0x85]]  ;;  %s69_s14 = scalar_lea.vmem %s2676_s1, %s1721_s3  ;;  %v2265_v34 = vld [vmem:[#allocation7 + $0x60] ss:$16 sps:$4 sm:$0xff]   ;;  %v186_v62 = vsub.s32 0, %v2347_v61 }
  0x3f   :  { %s73_s17 = scalar_lea.vmem %s2676_s1, %s1722_s25  ;;  %v70_v7 = vld [vmem:[%s69_s14] sm:$0x1]  ;;  %s77_s20 = scalar_lea.vmem %s2676_s1, %s1723_s26  ;;  %v2273_v36 = vld [vmem:[#allocation7 + $0x84] ss:$16 sps:$4 sm:$0xff]   ;;  %v2275_v37 = vld [vmem:[#allocation7 + $0x8c] ss:$16 sps:$4 sm:$0xff]  }
  0x40   :  { %v74_v8 = vld [vmem:[%s73_s17] sm:$0x1]  ;;  %s81_s22 = scalar_lea.vmem %s2676_s1, %s1724_s27  ;;  %71 = vst.msk [vmem:[#allocation2 + $0x1] sm:$0x1] %vm66_vm0, %v70_v7  ;;  %s85_s3 = scalar_lea.vmem %s2676_s1, %s1725_s28  ;;  %430 = vmatpush1.bf16.msra.mxu0 %v2265_v34  ;;  %v2279_v39 = vld [vmem:[#allocation7 + $0x88] ss:$16 sps:$4 sm:$0xff]  }
  0x41   :  { %75 = vst.msk [vmem:[#allocation2 + $0x2] sm:$0x1] %vm66_vm0, %v74_v8  ;;  %v78_v9 = vld [vmem:[%s77_s20] sm:$0x1]  ;;  %s89_s26 = scalar_lea.vmem %s2676_s1, %s1726_s29  ;;  %s93_s6 = scalar_lea.vmem %s2676_s1, %s1727_s7  ;;  %431 = vmatprep.subr.bf16.mxu0 %v2273_v36  ;;  %v2285_v40 = vld [vmem:[#allocation7 + $0xa4] ss:$16 sps:$4 sm:$0xff]  }
  0x42   :  { %v82_v10 = vld [vmem:[%s81_s22] sm:$0x1]  ;;  %79 = vst.msk [vmem:[#allocation2 + $0x3] sm:$0x1] %vm66_vm0, %v78_v9  ;;  %s97_s29 = scalar_lea.vmem %s2676_s1, %s2168_s8  ;;  %s101_s16 = scalar_lea.vmem %s2676_s1, %s2170_s9  ;;  %v2287_v41 = vld [vmem:[#allocation7 + $0xac] ss:$16 sps:$4 sm:$0xff]  }
  0x43   :  { %83 = vst.msk [vmem:[#allocation2 + $0x4] sm:$0x1] %vm66_vm0, %v82_v10  ;;  %v86_v11 = vld [vmem:[%s85_s3] sm:$0x1]  ;;  %s105_s18 = scalar_lea.vmem %s2676_s1, %s2173_s10  ;;  %s1733_s8 = sld [smem:[#allocation3 + $0x86]]  ;;  %v190_v1 = vsub.s32 1, %v2347_v61 }
  0x44   :  { %v90_v12 = vld [vmem:[%s89_s26] sm:$0x1]  ;;  %87 = vst.msk [vmem:[#allocation2 + $0x5] sm:$0x1] %vm66_vm0, %v86_v11  ;;  %s109_s2 = scalar_lea.vmem %s2676_s1, %s2175_s11  ;;  %s1734_s9 = sld [smem:[#allocation3 + $0x7]]  ;;  %v194_v6 = vsub.s32 2, %v2347_v61 }
  0x45   :  { %91 = vst.msk [vmem:[#allocation2 + $0x6] sm:$0x1] %vm66_vm0, %v90_v12  ;;  %v94_v13 = vld [vmem:[%s93_s6] sm:$0x1]  ;;  %s1735_s21 = sld [smem:[#allocation3 + $0x87]]  ;;  %s113_s10 = scalar_lea.vmem %s2676_s1, %s1732_s12  ;;  %v2681_v9 = vsub.s32 3, %v2347_v61 }
  0x46   :  { %95 = vst.msk [vmem:[#allocation2 + $0x7] sm:$0x1] %vm66_vm0, %v94_v13  ;;  %v98_v14 = vld [vmem:[%s97_s29] sm:$0x1]  ;;  %v2291_v43 = vld [vmem:[#allocation7 + $0xa8] ss:$16 sps:$4 sm:$0xff]  }
  0x47   :  { %v102_v15 = vld [vmem:[%s101_s16] sm:$0x1]  ;;  %99 = vst.msk [vmem:[#allocation2 + $0x8] sm:$0x1] %vm66_vm0, %v98_v14  ;;  %v2293_v44 = vld [vmem:[#allocation7 + $0xc4] ss:$16 sps:$4 sm:$0xff]  }
  0x48   :  { %103 = vst.msk [vmem:[#allocation2 + $0x9] sm:$0x1] %vm66_vm0, %v102_v15  ;;  %v106_v16 = vld [vmem:[%s105_s18] sm:$0x1]  ;;  %v2297_v45 = vld [vmem:[#allocation7 + $0xcc] ss:$16 sps:$4 sm:$0xff]  }
  0x49   :  { %v110_v17 = vld [vmem:[%s109_s2] sm:$0x1]  ;;  %107 = vst.msk [vmem:[#allocation2 + $0xa] sm:$0x1] %vm66_vm0, %v106_v16  ;;  %s117_s3 = scalar_lea.vmem %s2676_s1, %s1733_s8  ;;  %v2303_v47 = vld [vmem:[#allocation7 + $0xc8] ss:$16 sps:$4 sm:$0xff]  }
  0x4a   :  { %111 = vst.msk [vmem:[#allocation2 + $0xb] sm:$0x1] %vm66_vm0, %v110_v17  ;;  %v114_v18 = vld [vmem:[%s113_s10] sm:$0x1]  ;;  %s121_s26 = scalar_lea.vmem %s2676_s1, %s1734_s9  ;;  %v2307_v48 = vld [vmem:[#allocation7 + $0xe4] ss:$16 sps:$4 sm:$0xff]  }
  0x4b   :  { %115 = vst.msk [vmem:[#allocation2 + $0xc] sm:$0x1] %vm66_vm0, %v114_v18  ;;  %v118_v19 = vld [vmem:[%s117_s3] sm:$0x1]  ;;  %s125_s6 = scalar_lea.vmem %s2676_s1, %s1735_s21  ;;  %v2309_v49 = vld [vmem:[#allocation7 + $0xec] ss:$16 sps:$4 sm:$0xff]  }
  0x4c   :  { %119 = vst.msk [vmem:[#allocation2 + $0xd] sm:$0x1] %vm66_vm0, %v118_v19  ;;  %v122_v20 = vld [vmem:[%s121_s26] sm:$0x1]  ;;  %v2315_v51 = vld [vmem:[#allocation7 + $0xe8] ss:$16 sps:$4 sm:$0xff]  }
  0x4d   :  { %v126_v21 = vld [vmem:[%s125_s6] sm:$0x1]  ;;  %123 = vst.msk [vmem:[#allocation2 + $0xe] sm:$0x1] %vm66_vm0, %v122_v20  ;;  %v2319_v52 = vld [vmem:[#allocation7 + $0x104] ss:$16 sps:$4 sm:$0xff]  }
  0x4e   :  { %127 = vst.msk [vmem:[#allocation2 + $0xf] sm:$0x1] %vm66_vm0, %v126_v21  ;;  %v128_v22 = vld [vmem:[#allocation2] sm:$0xff]  ;;  %v2321_v53 = vld [vmem:[#allocation7 + $0x10c] ss:$16 sps:$4 sm:$0xff]   ;;  %s2105_s15 = smov [#allocation10]  }
  0x4f   :  { %v2277_v38 = vld [vmem:[#allocation7 + $0x80] ss:$16 sps:$4 sm:$0xff]   ;;  %v2327_v55 = vld [vmem:[#allocation7 + $0x108] ss:$16 sps:$4 sm:$0xff]   ;;  %v2331_v56 = vld [vmem:[#allocation7 + $0x124] ss:$16 sps:$4 sm:$0xff]  }
  0x50   :  { %432 = vmatpush1.bf16.msra.mxu0 %v2277_v38  ;;  %v2289_v42 = vld [vmem:[#allocation7 + $0xa0] ss:$16 sps:$4 sm:$0xff]   ;;  %v2333_v57 = vld [vmem:[#allocation7 + $0x12c] ss:$16 sps:$4 sm:$0xff]   ;;  %v2339_v59 = vld [vmem:[#allocation7 + $0x128] ss:$16 sps:$4 sm:$0xff]  }
  0x51   :  { %433 = vmatprep.subr.bf16.mxu0 %v2285_v40  ;;  %v2301_v46 = vld [vmem:[#allocation7 + $0xc0] ss:$16 sps:$4 sm:$0xff]   ;;  %s1694_s16 = sshll.u32 %s2105_s15, 4  ;;  %vm1686_vm2 = vcmask 402432   ;;  %s1695_s16 = int_to_ptr.vmem [resolvable:$true] %s1694_s16 }
  0x52   :  { %v2313_v50 = vld [vmem:[#allocation7 + $0xe0] ss:$16 sps:$4 sm:$0xff]   ;;  %s2067_s17 = scalar_lea.vmem %s1695_s16, 32  ;;  %p2072_p8 = scmp.lt.s32.totalorder %s1695_s16, %s1695_s16 }
  0x53   :  { %v2325_v54 = vld [vmem:[#allocation7 + $0x100] ss:$16 sps:$4 sm:$0xff]   ;;  %p2068_p7 = scmp.ne.s32.totalorder %s1695_s16, %s2067_s17  ;;  %p2073_p9 = scmp.lt.s32.totalorder %s2067_s17, %s2067_s17 }
  0x54   :  { %434 = vmatpush1.bf16.msra.mxu0 %v2289_v42  ;;  %v2337_v58 = vld [vmem:[#allocation7 + $0x120] ss:$16 sps:$4 sm:$0xff]  }
  0x55   :  { %v129_v25 = vld [vmem:[#allocation2 + $0x8] sm:$0xff]  ;;  %435 = vmatprep.subr.bf16.mxu0 %v2293_v44  ;;  %p2074_p10 = por %p2073_p9, %p2072_p8 }
  0x56   :  { %v2241_v26 = vpack.c.bf16 %v129_v25, %v128_v22  ;;  %v179_v63 = vld [vmem:[%s2679_s4] ss:$4 sm:$0xf] }
  0x57   :  { %v187_v0 = vrot.slane %v179_v63, %v186_v62  ;;  %v2361_v7 = vrot.slane %v179_v63, %v190_v1  ;;  %v195_v14 = vrot.slane %v179_v63, %v194_v6  ;;  %v199_v15 = vrot.slane %v179_v63, %v2681_v9  ;;  %p2075_p11 = pnand %p2074_p10, %p2068_p7 }
  0x58   :  { %1745 = vmatmul.mubr.msk.bf16.vlgmr.msra.gmra.mrb[0].mxu1 %vm244_vm1, %v2241_v26  ;;  %436 = vmatpush1.bf16.msra.mxu0 %v2301_v46 }
  0x59   :  { %292 = vmatpush1.bf16.msra.mxu1 %v1843_v23  ;;  %323 = vmatprep.mubr.bf16.mxu1 %v2104_v2 }
  0x5a   :  { %293 = vmatprep.subr.bf16.mxu1 %v1848_v24  ;;  %437 = vmatprep.subr.bf16.mxu0 %v2307_v48 }
  0x5c   :  { %438 = vmatpush1.bf16.msra.mxu0 %v2313_v50 }
  0x5d   :  { %294 = vmatpush1.bf16.msra.mxu1 %v1846_v27  ;;  %439 = vmatprep.subr.bf16.mxu0 %v2319_v52 }
  0x5e   :  { %556 = vmatprep.subr.bf16.mxu1 %v2251_v29 }
  0x60   :  { %1746 = vmatmul.mubr.msk.bf16.vlgmr.msra.gmra.mrb[4].mxu1 %vm244_vm1, %v2241_v26  ;;  %440 = vmatpush1.bf16.msra.mxu0 %v2325_v54 }
  0x61   :  { %588 = vmatprep.mubr.bf16.mxu1 %v2104_v2  ;;  %557 = vmatpush1.bf16.msra.mxu1 %v2255_v31 }
  0x62   :  { %558 = vmatprep.subr.bf16.mxu1 %v2263_v33  ;;  %441 = vmatprep.subr.bf16.mxu0 %v2331_v56 }
  0x64   :  { %442 = vmatpush1.bf16.msra.mxu0 %v2337_v58 }
  0x65   :  { %559 = vmatpush1.bf16.msra.mxu1 %v2267_v35  ;;  %630 = vmatprep.subr.bf16.mxu0 %v2249_v28 }
  0x66   :  { %560 = vmatprep.subr.bf16.mxu1 %v2275_v37 }
  0x69   :  { %561 = vmatpush1.bf16.msra.mxu1 %v2279_v39 }
  0x6a   :  { %562 = vmatprep.subr.bf16.mxu1 %v2287_v41 }
  0x6d   :  { %563 = vmatpush1.bf16.msra.mxu1 %v2291_v43 }
  0x6e   :  { %564 = vmatprep.subr.bf16.mxu1 %v2297_v45 }
  0x71   :  { %565 = vmatpush1.bf16.msra.mxu1 %v2303_v47 }
  0x72   :  { %566 = vmatprep.subr.bf16.mxu1 %v2309_v49 }
  0x75   :  { %567 = vmatpush1.bf16.msra.mxu1 %v2315_v51 }
  0x76   :  { %568 = vmatprep.subr.bf16.mxu1 %v2321_v53 }
  0x79   :  { %569 = vmatpush1.bf16.msra.mxu1 %v2327_v55 }
  0x7a   :  { %570 = vmatprep.subr.bf16.mxu1 %v2333_v57 }
  0x7d   :  { %571 = vmatpush1.bf16.msra.mxu1 %v2339_v59 }
  0x7e   :  { %679 = vmatprep.subr.bf16.mxu1 %v2251_v29 }
 0x12b   :  { %v282_v3 = vpop.f32.mrb[0].mxu1 }
 0x12c   :  { %v2356_v4 = vadd.f32 %v282_v3, %v187_v0  ;;  %v2358_v5 = vpop.f32.mrb[1].mxu1 }
 0x12d   :  { %v286_v8 = vpop.f32.mrb[2].mxu1 }
 0x12e   :  { %v334_v10 = vmul.f32 0.5, %v2356_v4  ;;  %v2365_v11 = vadd.f32 %v286_v8, %v187_v0  ;;  %v288_v12 = vpop.f32.mrb[3].mxu1 }
 0x12f   :  { %v2368_v13 = vadd.f32 %v288_v12, %v2361_v7 }
 0x130   :  { %1925 = vtanh.f32 %v334_v10 }
 0x133   :  { %v325_v16 = vpop.f32.mrb[4].mxu1 }
 0x134   :  { %v2374_v17 = vadd.f32 %v325_v16, %v195_v14  ;;  %v327_v18 = vpop.f32.mrb[5].mxu1 }
 0x135   :  { %v2376_v19 = vadd.f32 %v327_v18, %v199_v15  ;;  %v329_v20 = vpop.f32.mrb[6].mxu1 }
 0x136   :  { %1927 = vtanh.f32 %v2374_v17  ;;  %v2379_v21 = vadd.f32 %v329_v20, %v195_v14  ;;  %v331_v22 = vpop.f32.mrb[7].mxu1 }
 0x137   :  { %v339_v23 = vmul.f32 0.5, %v2376_v19  ;;  %v2382_v24 = vadd.f32 %v331_v22, %v199_v15 }
 0x139   :  { %1929 = vtanh.f32 %v339_v23  ;;  %v2423_v23 = vadd.f32 %v2358_v5, %v2361_v7 }
 0x13a   :  { %v1926_v25 = vpop.eup %1925 }
 0x13b   :  { %v336_v27 = vmul.f32 0.5, %v1926_v25 }
 0x13d   :  { %v337_v60 = vadd.f32 0.5, %v336_v27 }
 0x140   :  { %v1928_v63 = vpop.eup %1927 }
 0x141   :  { %v2384_v0 = vmul.f32 %v1928_v63, %v337_v60 }
 0x143   :  { %1931 = vtanh.f32 %v2384_v0  ;;  %v1930_v1 = vpop.eup %1929 }
 0x144   :  { %v341_v3 = vmul.f32 0.5, %v1930_v1 }
 0x146   :  { %v342_v8 = vadd.f32 0.5, %v341_v3 }
 0x14d   :  { %v1932_v10 = vpop.eup %1931 }
 0x14e   :  { %v345_v12 = vmul.f32 %v1932_v10, %v342_v8 }
 0x150   :  { %v346_v14 = vpack.c.bf16 %v345_v12, %v345_v12 }
 0x152   :  { %460 = vmatmul.mubr.bf16.vlgmr.msra.gmra.mrb[0].mxu0 %v346_v14  ;;  %589 = vmatmul.mubr.bf16.vlgmr.msra.gmra.mrb[8].mxu1 %v346_v14 }
 0x153   :  { %631 = vmatpush1.bf16.msra.mxu0 %v2253_v30  ;;  %680 = vmatpush1.bf16.msra.mxu1 %v2255_v31 }
 0x154   :  { %632 = vmatprep.subr.bf16.mxu0 %v2261_v32  ;;  %681 = vmatprep.subr.bf16.mxu1 %v2263_v33 }
 0x155   :  { %662 = vmatprep.mubr.bf16.mxu0 %v2104_v2  ;;  %711 = vmatprep.mubr.bf16.mxu1 %v2104_v2 }
 0x157   :  { %633 = vmatpush1.bf16.msra.mxu0 %v2265_v34  ;;  %682 = vmatpush1.bf16.msra.mxu1 %v2267_v35 }
 0x158   :  { %634 = vmatprep.subr.bf16.mxu0 %v2273_v36  ;;  %683 = vmatprep.subr.bf16.mxu1 %v2275_v37 }
 0x15b   :  { %635 = vmatpush1.bf16.msra.mxu0 %v2277_v38  ;;  %684 = vmatpush1.bf16.msra.mxu1 %v2279_v39 }
 0x15c   :  { %636 = vmatprep.subr.bf16.mxu0 %v2285_v40  ;;  %685 = vmatprep.subr.bf16.mxu1 %v2287_v41 }
 0x15f   :  { %637 = vmatpush1.bf16.msra.mxu0 %v2289_v42  ;;  %686 = vmatpush1.bf16.msra.mxu1 %v2291_v43 }
 0x160   :  { %638 = vmatprep.subr.bf16.mxu0 %v2293_v44  ;;  %687 = vmatprep.subr.bf16.mxu1 %v2297_v45 }
 0x163   :  { %639 = vmatpush1.bf16.msra.mxu0 %v2301_v46  ;;  %688 = vmatpush1.bf16.msra.mxu1 %v2303_v47 }
 0x164   :  { %640 = vmatprep.subr.bf16.mxu0 %v2307_v48  ;;  %689 = vmatprep.subr.bf16.mxu1 %v2309_v49 }
 0x167   :  { %641 = vmatpush1.bf16.msra.mxu0 %v2313_v50  ;;  %690 = vmatpush1.bf16.msra.mxu1 %v2315_v51 }
 0x168   :  { %642 = vmatprep.subr.bf16.mxu0 %v2319_v52  ;;  %691 = vmatprep.subr.bf16.mxu1 %v2321_v53 }
 0x16b   :  { %643 = vmatpush1.bf16.msra.mxu0 %v2325_v54  ;;  %692 = vmatpush1.bf16.msra.mxu1 %v2327_v55 }
 0x16c   :  { %644 = vmatprep.subr.bf16.mxu0 %v2331_v56  ;;  %693 = vmatprep.subr.bf16.mxu1 %v2333_v57 }
 0x16f   :  { %645 = vmatpush1.bf16.msra.mxu0 %v2337_v58  ;;  %694 = vmatpush1.bf16.msra.mxu1 %v2339_v59 }
 0x170   :  { %753 = vmatprep.subr.bf16.mxu0 %v2249_v28  ;;  %802 = vmatprep.subr.bf16.mxu1 %v2251_v29 }
 0x225   :  { %v461_v15 = vpop.f32.mrb[0].mxu0  ;;  %v590_v16 = vpop.f32.mrb[8].mxu1 }
 0x226   :  { %v470_v18 = vrot.slane %v461_v15, 6  ;;  %v463_v20 = vpop.f32.mrb[1].mxu0  ;;  %v592_v22 = vpop.f32.mrb[9].mxu1  ;;  %v599_v1 = vrot.slane %v590_v16, 6 }
 0x227   :  { %v471_v25 = vrot.slane %v463_v20, 6  ;;  %v465_v27 = vpop.f32.mrb[2].mxu0  ;;  %v594_v60 = vpop.f32.mrb[10].mxu1  ;;  %v600_v9 = vrot.slane %v592_v22, 6 }
 0x228   :  { %v474_v63 = vadd.f32 %v470_v18, %v2356_v4  ;;  %v466_v3 = vpop.f32.mrb[3].mxu0  ;;  %v595_v8 = vpop.f32.mrb[11].mxu1  ;;  %v603_v15 = vadd.f32 %v599_v1, %v2374_v17 }
 0x229   :  { %v475_v10 = vadd.f32 %v471_v25, %v2423_v23  ;;  %v604_v5 = vadd.f32 %v600_v9, %v2376_v19  ;;  %v619_v25 = vrot.slane %v2384_v0, 6 }
 0x22a   :  { %v605_v12 = vmul.f32 0.5, %v474_v63 }
 0x22b   :  { %v609_v14 = vmul.f32 0.5, %v475_v10  ;;  %v614_v7 = vmul.f32 0.5, %v604_v5 }
 0x22c   :  { %1933 = vtanh.f32 %v605_v12 }
 0x22d   :  { %1935 = vtanh.f32 %v609_v14 }
 0x22e   :  { %1937 = vtanh.f32 %v603_v15 }
 0x22f   :  { %1939 = vtanh.f32 %v614_v7 }
 0x236   :  { %v1934_v20 = vpop.eup %1933 }
 0x237   :  { %v1936_v27 = vpop.eup %1935  ;;  %v607_v60 = vmul.f32 0.5, %v1934_v20 }
 0x238   :  { %v611_v18 = vmul.f32 0.5, %v1936_v27  ;;  %v1938_v3 = vpop.eup %1937 }
 0x239   :  { %v608_v16 = vadd.f32 0.5, %v607_v60  ;;  %v1940_v22 = vpop.eup %1939 }
 0x23a   :  { %v612_v8 = vadd.f32 0.5, %v611_v18  ;;  %v616_v1 = vmul.f32 0.5, %v1940_v22 }
 0x23b   :  { %v622_v63 = vmul.f32 %v1938_v3, %v608_v16 }
 0x23c   :  { %v621_v10 = vmul.f32 %v619_v25, %v612_v8  ;;  %v617_v9 = vadd.f32 0.5, %v616_v1 }
 0x23e   :  { %v2430_v12 = vadd.f32 %v622_v63, %v621_v10 }
 0x240   :  { %1941 = vtanh.f32 %v2430_v12 }
 0x24a   :  { %v1942_v14 = vpop.eup %1941 }
 0x24b   :  { %v625_v15 = vmul.f32 %v1942_v14, %v617_v9 }
 0x24d   :  { %v626_v5 = vpack.c.bf16 %v625_v15, %v625_v15 }
 0x24f   :  { %v628_v20 = vrot.slane %v626_v5, 1 }
 0x251   :  { %663 = vmatmul.mubr.bf16.vlgmr.msra.gmra.mrb[4].mxu0 %v628_v20  ;;  %712 = vmatmul.mubr.bf16.vlgmr.msra.gmra.mrb[12].mxu1 %v628_v20 }
 0x252   :  { %754 = vmatpush1.bf16.msra.mxu0 %v2253_v30  ;;  %803 = vmatpush1.bf16.msra.mxu1 %v2255_v31 }
 0x253   :  { %755 = vmatprep.subr.bf16.mxu0 %v2261_v32  ;;  %804 = vmatprep.subr.bf16.mxu1 %v2263_v33 }
 0x254   :  { %785 = vmatprep.mubr.bf16.mxu0 %v2104_v2  ;;  %834 = vmatprep.mubr.bf16.mxu1 %v2104_v2 }
 0x256   :  { %756 = vmatpush1.bf16.msra.mxu0 %v2265_v34  ;;  %805 = vmatpush1.bf16.msra.mxu1 %v2267_v35 }
 0x257   :  { %757 = vmatprep.subr.bf16.mxu0 %v2273_v36  ;;  %806 = vmatprep.subr.bf16.mxu1 %v2275_v37 }
 0x25a   :  { %758 = vmatpush1.bf16.msra.mxu0 %v2277_v38  ;;  %807 = vmatpush1.bf16.msra.mxu1 %v2279_v39 }
 0x25b   :  { %759 = vmatprep.subr.bf16.mxu0 %v2285_v40  ;;  %808 = vmatprep.subr.bf16.mxu1 %v2287_v41 }
 0x25e   :  { %760 = vmatpush1.bf16.msra.mxu0 %v2289_v42  ;;  %809 = vmatpush1.bf16.msra.mxu1 %v2291_v43 }
 0x25f   :  { %761 = vmatprep.subr.bf16.mxu0 %v2293_v44  ;;  %810 = vmatprep.subr.bf16.mxu1 %v2297_v45 }
 0x262   :  { %762 = vmatpush1.bf16.msra.mxu0 %v2301_v46  ;;  %811 = vmatpush1.bf16.msra.mxu1 %v2303_v47 }
 0x263   :  { %763 = vmatprep.subr.bf16.mxu0 %v2307_v48  ;;  %812 = vmatprep.subr.bf16.mxu1 %v2309_v49 }
 0x266   :  { %764 = vmatpush1.bf16.msra.mxu0 %v2313_v50  ;;  %813 = vmatpush1.bf16.msra.mxu1 %v2315_v51 }
 0x267   :  { %765 = vmatprep.subr.bf16.mxu0 %v2319_v52  ;;  %814 = vmatprep.subr.bf16.mxu1 %v2321_v53 }
 0x26a   :  { %766 = vmatpush1.bf16.msra.mxu0 %v2325_v54  ;;  %815 = vmatpush1.bf16.msra.mxu1 %v2327_v55 }
 0x26b   :  { %767 = vmatprep.subr.bf16.mxu0 %v2331_v56  ;;  %816 = vmatprep.subr.bf16.mxu1 %v2333_v57 }
 0x26e   :  { %768 = vmatpush1.bf16.msra.mxu0 %v2337_v58  ;;  %817 = vmatpush1.bf16.msra.mxu1 %v2339_v59 }
 0x26f   :  { %876 = vmatprep.subr.bf16.mxu0 %v2249_v28  ;;  %919 = vmatprep.subr.bf16.mxu1 %v2251_v29 }
 0x324   :  { %v664_v0 = vpop.f32.mrb[4].mxu0  ;;  %v713_v7 = vpop.f32.mrb[12].mxu1 }
 0x325   :  { %v673_v27 = vrot.slane %v664_v0, 4  ;;  %v666_v60 = vpop.f32.mrb[5].mxu0  ;;  %v715_v18 = vpop.f32.mrb[13].mxu1  ;;  %v722_v63 = vrot.slane %v713_v7, 4 }
 0x326   :  { %v674_v16 = vrot.slane %v666_v60, 4  ;;  %v668_v3 = vpop.f32.mrb[6].mxu0  ;;  %v717_v8 = vpop.f32.mrb[14].mxu1  ;;  %v723_v5 = vrot.slane %v715_v18, 4 }
 0x327   :  { %v677_v25 = vadd.f32 %v673_v27, %v2356_v4  ;;  %v669_v10 = vpop.f32.mrb[7].mxu0  ;;  %v718_v22 = vpop.f32.mrb[15].mxu1  ;;  %v726_v15 = vadd.f32 %v722_v63, %v2374_v17 }
 0x328   :  { %v678_v1 = vadd.f32 %v674_v16, %v2423_v23  ;;  %v727_v20 = vadd.f32 %v723_v5, %v2376_v19  ;;  %v742_v16 = vrot.slane %v2430_v12, 6 }
 0x329   :  { %v728_v9 = vmul.f32 0.5, %v677_v25 }
 0x32a   :  { %v732_v14 = vmul.f32 0.5, %v678_v1  ;;  %v737_v0 = vmul.f32 0.5, %v727_v20 }
 0x32b   :  { %1943 = vtanh.f32 %v728_v9 }
 0x32c   :  { %1945 = vtanh.f32 %v732_v14 }
 0x32d   :  { %1947 = vtanh.f32 %v726_v15 }
 0x32e   :  { %1949 = vtanh.f32 %v737_v0 }
 0x335   :  { %v1944_v60 = vpop.eup %1943 }
 0x336   :  { %v1946_v3 = vpop.eup %1945  ;;  %v730_v8 = vmul.f32 0.5, %v1944_v60 }
 0x337   :  { %v734_v27 = vmul.f32 0.5, %v1946_v3  ;;  %v1948_v10 = vpop.eup %1947 }
 0x338   :  { %v731_v7 = vadd.f32 0.5, %v730_v8  ;;  %v1950_v18 = vpop.eup %1949 }
 0x339   :  { %v735_v22 = vadd.f32 0.5, %v734_v27  ;;  %v739_v63 = vmul.f32 0.5, %v1950_v18 }
 0x33a   :  { %v745_v25 = vmul.f32 %v1948_v10, %v731_v7 }
 0x33b   :  { %v744_v1 = vmul.f32 %v742_v16, %v735_v22  ;;  %v740_v14 = vadd.f32 0.5, %v739_v63 }
 0x33d   :  { %v2472_v9 = vadd.f32 %v745_v25, %v744_v1 }
 0x33f   :  { %1951 = vtanh.f32 %v2472_v9 }
 0x349   :  { %v1952_v15 = vpop.eup %1951 }
 0x34a   :  { %v748_v5 = vmul.f32 %v1952_v15, %v740_v14 }
 0x34c   :  { %v749_v20 = vpack.c.bf16 %v748_v5, %v748_v5 }
 0x34e   :  { %v751_v60 = vrot.slane %v749_v20, 2 }
 0x350   :  { %786 = vmatmul.mubr.bf16.vlgmr.msra.gmra.mrb[8].mxu0 %v751_v60  ;;  %835 = vmatmul.mubr.bf16.vlgmr.msra.gmra.mrb[16].mxu1 %v751_v60 }
 0x351   :  { %877 = vmatpush1.bf16.msra.mxu0 %v2253_v30  ;;  %920 = vmatpush1.bf16.msra.mxu1 %v2255_v31 }
 0x352   :  { %878 = vmatprep.subr.bf16.mxu0 %v2261_v32  ;;  %921 = vmatprep.subr.bf16.mxu1 %v2263_v33 }
 0x353   :  { %908 = vmatprep.mubr.bf16.mxu0 %v2104_v2  ;;  %951 = vmatprep.mubr.bf16.mxu1 %v2104_v2 }
 0x355   :  { %879 = vmatpush1.bf16.msra.mxu0 %v2265_v34  ;;  %922 = vmatpush1.bf16.msra.mxu1 %v2267_v35 }
 0x356   :  { %880 = vmatprep.subr.bf16.mxu0 %v2273_v36  ;;  %923 = vmatprep.subr.bf16.mxu1 %v2275_v37 }
 0x359   :  { %881 = vmatpush1.bf16.msra.mxu0 %v2277_v38  ;;  %924 = vmatpush1.bf16.msra.mxu1 %v2279_v39 }
 0x35a   :  { %882 = vmatprep.subr.bf16.mxu0 %v2285_v40  ;;  %925 = vmatprep.subr.bf16.mxu1 %v2287_v41 }
 0x35d   :  { %883 = vmatpush1.bf16.msra.mxu0 %v2289_v42  ;;  %926 = vmatpush1.bf16.msra.mxu1 %v2291_v43 }
 0x35e   :  { %884 = vmatprep.subr.bf16.mxu0 %v2293_v44  ;;  %927 = vmatprep.subr.bf16.mxu1 %v2297_v45 }
 0x361   :  { %885 = vmatpush1.bf16.msra.mxu0 %v2301_v46  ;;  %928 = vmatpush1.bf16.msra.mxu1 %v2303_v47 }
 0x362   :  { %886 = vmatprep.subr.bf16.mxu0 %v2307_v48  ;;  %929 = vmatprep.subr.bf16.mxu1 %v2309_v49 }
 0x365   :  { %887 = vmatpush1.bf16.msra.mxu0 %v2313_v50  ;;  %930 = vmatpush1.bf16.msra.mxu1 %v2315_v51 }
 0x366   :  { %888 = vmatprep.subr.bf16.mxu0 %v2319_v52  ;;  %931 = vmatprep.subr.bf16.mxu1 %v2321_v53 }
 0x369   :  { %889 = vmatpush1.bf16.msra.mxu0 %v2325_v54  ;;  %932 = vmatpush1.bf16.msra.mxu1 %v2327_v55 }
 0x36a   :  { %890 = vmatprep.subr.bf16.mxu0 %v2331_v56  ;;  %933 = vmatprep.subr.bf16.mxu1 %v2333_v57 }
 0x36d   :  { %891 = vmatpush1.bf16.msra.mxu0 %v2337_v58  ;;  %934 = vmatpush1.bf16.msra.mxu1 %v2339_v59 }
 0x36e   :  { %984 = vmatprep.subr.bf16.mxu0 %v2249_v28  ;;  %1033 = vmatprep.subr.bf16.mxu1 %v2251_v29 }
 0x423   :  { %v787_v12 = vpop.f32.mrb[8].mxu0  ;;  %v836_v0 = vpop.f32.mrb[16].mxu1 }
 0x424   :  { %v796_v3 = vrot.slane %v787_v12, 2  ;;  %v789_v8 = vpop.f32.mrb[9].mxu0  ;;  %v838_v27 = vpop.f32.mrb[17].mxu1  ;;  %v845_v25 = vrot.slane %v836_v0, 2 }
 0x425   :  { %v797_v7 = vrot.slane %v789_v8, 2  ;;  %v791_v10 = vpop.f32.mrb[10].mxu0  ;;  %v840_v22 = vpop.f32.mrb[18].mxu1  ;;  %v846_v20 = vrot.slane %v838_v27, 2 }
 0x426   :  { %v800_v16 = vadd.f32 %v796_v3, %v2356_v4  ;;  %v792_v1 = vpop.f32.mrb[11].mxu0  ;;  %v841_v18 = vpop.f32.mrb[19].mxu1  ;;  %v849_v5 = vadd.f32 %v845_v25, %v2374_v17 }
 0x427   :  { %v801_v63 = vadd.f32 %v797_v7, %v2423_v23  ;;  %v850_v60 = vadd.f32 %v846_v20, %v2376_v19  ;;  %v865_v23 = vrot.slane %v2472_v9, 6 }
 0x428   :  { %v851_v14 = vmul.f32 0.5, %v800_v16 }
 0x429   :  { %v855_v15 = vmul.f32 0.5, %v801_v63  ;;  %v860_v12 = vmul.f32 0.5, %v850_v60 }
 0x42a   :  { %1953 = vtanh.f32 %v851_v14 }
 0x42b   :  { %1955 = vtanh.f32 %v855_v15 }
 0x42c   :  { %1957 = vtanh.f32 %v849_v5 }
 0x42d   :  { %1959 = vtanh.f32 %v860_v12 }
 0x434   :  { %v1954_v8 = vpop.eup %1953 }
 0x435   :  { %v1956_v10 = vpop.eup %1955  ;;  %v853_v22 = vmul.f32 0.5, %v1954_v8 }
 0x436   :  { %v857_v4 = vmul.f32 0.5, %v1956_v10  ;;  %v1958_v3 = vpop.eup %1957 }
 0x437   :  { %v854_v0 = vadd.f32 0.5, %v853_v22  ;;  %v1960_v17 = vpop.eup %1959 }
 0x438   :  { %v858_v1 = vadd.f32 0.5, %v857_v4  ;;  %v862_v27 = vmul.f32 0.5, %v1960_v17 }
 0x439   :  { %v868_v7 = vmul.f32 %v1958_v3, %v854_v0 }
 0x43a   :  { %v867_v16 = vmul.f32 %v865_v23, %v858_v1  ;;  %v863_v19 = vadd.f32 0.5, %v862_v27 }
 0x43c   :  { %v2514_v18 = vadd.f32 %v868_v7, %v867_v16 }
 0x43e   :  { %1961 = vtanh.f32 %v2514_v18 }
 0x448   :  { %v1962_v25 = vpop.eup %1961 }
 0x449   :  { %v871_v63 = vmul.f32 %v1962_v25, %v863_v19 }
 0x44b   :  { %v872_v14 = vpack.c.bf16 %v871_v63, %v871_v63 }
 0x44d   :  { %v874_v15 = vrot.slane %v872_v14, 3 }
 0x44f   :  { %909 = vmatmul.mubr.bf16.vlgmr.msra.gmra.mrb[12].mxu0 %v874_v15  ;;  %952 = vmatmul.mubr.bf16.vlgmr.msra.gmra.mrb[20].mxu1 %v874_v15 }
 0x450   :  { %985 = vmatpush1.bf16.msra.mxu0 %v2253_v30  ;;  %1034 = vmatpush1.bf16.msra.mxu1 %v2255_v31 }
 0x451   :  { %986 = vmatprep.subr.bf16.mxu0 %v2261_v32  ;;  %1035 = vmatprep.subr.bf16.mxu1 %v2263_v33 }
 0x452   :  { %1016 = vmatprep.mubr.bf16.mxu0 %v2104_v2  ;;  %1065 = vmatprep.mubr.bf16.mxu1 %v2104_v2 }
 0x454   :  { %987 = vmatpush1.bf16.msra.mxu0 %v2265_v34  ;;  %1036 = vmatpush1.bf16.msra.mxu1 %v2267_v35 }
 0x455   :  { %988 = vmatprep.subr.bf16.mxu0 %v2273_v36  ;;  %1037 = vmatprep.subr.bf16.mxu1 %v2275_v37 }
 0x458   :  { %989 = vmatpush1.bf16.msra.mxu0 %v2277_v38  ;;  %1038 = vmatpush1.bf16.msra.mxu1 %v2279_v39 }
 0x459   :  { %990 = vmatprep.subr.bf16.mxu0 %v2285_v40  ;;  %1039 = vmatprep.subr.bf16.mxu1 %v2287_v41 }
 0x45c   :  { %991 = vmatpush1.bf16.msra.mxu0 %v2289_v42  ;;  %1040 = vmatpush1.bf16.msra.mxu1 %v2291_v43 }
 0x45d   :  { %992 = vmatprep.subr.bf16.mxu0 %v2293_v44  ;;  %1041 = vmatprep.subr.bf16.mxu1 %v2297_v45 }
 0x460   :  { %993 = vmatpush1.bf16.msra.mxu0 %v2301_v46  ;;  %1042 = vmatpush1.bf16.msra.mxu1 %v2303_v47 }
 0x461   :  { %994 = vmatprep.subr.bf16.mxu0 %v2307_v48  ;;  %1043 = vmatprep.subr.bf16.mxu1 %v2309_v49 }
 0x464   :  { %995 = vmatpush1.bf16.msra.mxu0 %v2313_v50  ;;  %1044 = vmatpush1.bf16.msra.mxu1 %v2315_v51 }
 0x465   :  { %996 = vmatprep.subr.bf16.mxu0 %v2319_v52  ;;  %1045 = vmatprep.subr.bf16.mxu1 %v2321_v53 }
 0x468   :  { %997 = vmatpush1.bf16.msra.mxu0 %v2325_v54  ;;  %1046 = vmatpush1.bf16.msra.mxu1 %v2327_v55 }
 0x469   :  { %998 = vmatprep.subr.bf16.mxu0 %v2331_v56  ;;  %1047 = vmatprep.subr.bf16.mxu1 %v2333_v57 }
 0x46c   :  { %999 = vmatpush1.bf16.msra.mxu0 %v2337_v58  ;;  %1048 = vmatpush1.bf16.msra.mxu1 %v2339_v59 }
 0x46d   :  { %1107 = vmatprep.subr.bf16.mxu0 %v2249_v28  ;;  %1156 = vmatprep.subr.bf16.mxu1 %v2251_v29 }
 0x522   :  { %v910_v9 = vpop.f32.mrb[12].mxu0  ;;  %v953_v5 = vpop.f32.mrb[20].mxu1 }
 0x523   :  { %v917_v20 = vadd.f32 %v910_v9, %v2365_v11  ;;  %v912_v60 = vpop.f32.mrb[13].mxu0  ;;  %v955_v12 = vpop.f32.mrb[21].mxu1  ;;  %v960_v23 = vadd.f32 %v953_v5, %v2379_v21  ;;  %v976_v9 = vrot.slane %v2514_v18, 6 }
 0x524   :  { %v918_v8 = vadd.f32 %v912_v60, %v2368_v13  ;;  %v914_v10 = vpop.f32.mrb[14].mxu0  ;;  %v957_v22 = vpop.f32.mrb[22].mxu1  ;;  %v961_v7 = vadd.f32 %v955_v12, %v2382_v24 }
 0x525   :  { %v962_v4 = vmul.f32 0.5, %v917_v20  ;;  %v915_v0 = vpop.f32.mrb[15].mxu0  ;;  %v958_v3 = vpop.f32.mrb[23].mxu1 }
 0x526   :  { %v966_v1 = vmul.f32 0.5, %v918_v8  ;;  %v971_v16 = vmul.f32 0.5, %v961_v7 }
 0x527   :  { %1963 = vtanh.f32 %v962_v4 }
 0x528   :  { %1965 = vtanh.f32 %v966_v1 }
 0x529   :  { %1967 = vtanh.f32 %v960_v23 }
 0x52a   :  { %1969 = vtanh.f32 %v971_v16 }
 0x531   :  { %v1964_v17 = vpop.eup %1963 }
 0x532   :  { %v1966_v27 = vpop.eup %1965  ;;  %v964_v19 = vmul.f32 0.5, %v1964_v17 }
 0x533   :  { %v968_v25 = vmul.f32 0.5, %v1966_v27  ;;  %v1968_v14 = vpop.eup %1967 }
 0x534   :  { %v965_v63 = vadd.f32 0.5, %v964_v19  ;;  %v1970_v5 = vpop.eup %1969 }
 0x535   :  { %v969_v15 = vadd.f32 0.5, %v968_v25  ;;  %v973_v10 = vmul.f32 0.5, %v1970_v5 }
 0x536   :  { %v979_v20 = vmul.f32 %v1968_v14, %v965_v63 }
 0x537   :  { %v978_v60 = vmul.f32 %v976_v9, %v969_v15  ;;  %v974_v12 = vadd.f32 0.5, %v973_v10 }
 0x539   :  { %v2556_v8 = vadd.f32 %v979_v20, %v978_v60 }
 0x53b   :  { %1971 = vtanh.f32 %v2556_v8 }
 0x545   :  { %v1972_v22 = vpop.eup %1971 }
 0x546   :  { %v982_v4 = vmul.f32 %v1972_v22, %v974_v12 }
 0x548   :  { %v983_v0 = vpack.c.bf16 %v982_v4, %v982_v4 }
 0x54a   :  { %1017 = vmatmul.mubr.bf16.vlgmr.msra.gmra.mrb[16].mxu0 %v983_v0  ;;  %1066 = vmatmul.mubr.bf16.vlgmr.msra.gmra.mrb[24].mxu1 %v983_v0 }
 0x54b   :  { %1108 = vmatpush1.bf16.msra.mxu0 %v2253_v30  ;;  %1157 = vmatpush1.bf16.msra.mxu1 %v2255_v31 }
 0x54c   :  { %1109 = vmatprep.subr.bf16.mxu0 %v2261_v32  ;;  %1158 = vmatprep.subr.bf16.mxu1 %v2263_v33 }
 0x54d   :  { %1139 = vmatprep.mubr.bf16.mxu0 %v2104_v2  ;;  %1188 = vmatprep.mubr.bf16.mxu1 %v2104_v2 }
 0x54f   :  { %1110 = vmatpush1.bf16.msra.mxu0 %v2265_v34  ;;  %1159 = vmatpush1.bf16.msra.mxu1 %v2267_v35 }
 0x550   :  { %1111 = vmatprep.subr.bf16.mxu0 %v2273_v36  ;;  %1160 = vmatprep.subr.bf16.mxu1 %v2275_v37 }
 0x553   :  { %1112 = vmatpush1.bf16.msra.mxu0 %v2277_v38  ;;  %1161 = vmatpush1.bf16.msra.mxu1 %v2279_v39 }
 0x554   :  { %1113 = vmatprep.subr.bf16.mxu0 %v2285_v40  ;;  %1162 = vmatprep.subr.bf16.mxu1 %v2287_v41 }
 0x557   :  { %1114 = vmatpush1.bf16.msra.mxu0 %v2289_v42  ;;  %1163 = vmatpush1.bf16.msra.mxu1 %v2291_v43 }
 0x558   :  { %1115 = vmatprep.subr.bf16.mxu0 %v2293_v44  ;;  %1164 = vmatprep.subr.bf16.mxu1 %v2297_v45 }
 0x55b   :  { %1116 = vmatpush1.bf16.msra.mxu0 %v2301_v46  ;;  %1165 = vmatpush1.bf16.msra.mxu1 %v2303_v47 }
 0x55c   :  { %1117 = vmatprep.subr.bf16.mxu0 %v2307_v48  ;;  %1166 = vmatprep.subr.bf16.mxu1 %v2309_v49 }
 0x55f   :  { %1118 = vmatpush1.bf16.msra.mxu0 %v2313_v50  ;;  %1167 = vmatpush1.bf16.msra.mxu1 %v2315_v51 }
 0x560   :  { %1119 = vmatprep.subr.bf16.mxu0 %v2319_v52  ;;  %1168 = vmatprep.subr.bf16.mxu1 %v2321_v53 }
 0x563   :  { %1120 = vmatpush1.bf16.msra.mxu0 %v2325_v54  ;;  %1169 = vmatpush1.bf16.msra.mxu1 %v2327_v55 }
 0x564   :  { %1121 = vmatprep.subr.bf16.mxu0 %v2331_v56  ;;  %1170 = vmatprep.subr.bf16.mxu1 %v2333_v57 }
 0x567   :  { %1122 = vmatpush1.bf16.msra.mxu0 %v2337_v58  ;;  %1171 = vmatpush1.bf16.msra.mxu1 %v2339_v59 }
 0x568   :  { %1279 = vmatprep.subr.bf16.mxu1 %v2251_v29  ;;  %1230 = vmatprep.subr.bf16.mxu0 %v2249_v28 }
 0x61d   :  { %v1018_v18 = vpop.f32.mrb[16].mxu0  ;;  %v1067_v3 = vpop.f32.mrb[24].mxu1 }
 0x61e   :  { %v1027_v1 = vrot.slane %v1018_v18, 6  ;;  %v1020_v23 = vpop.f32.mrb[17].mxu0  ;;  %v1069_v7 = vpop.f32.mrb[25].mxu1  ;;  %v1076_v25 = vrot.slane %v1067_v3, 6 }
 0x61f   :  { %v1028_v16 = vrot.slane %v1020_v23, 6  ;;  %v1022_v17 = vpop.f32.mrb[18].mxu0  ;;  %v1071_v27 = vpop.f32.mrb[26].mxu1  ;;  %v1077_v29 = vrot.slane %v1069_v7, 6 }
 0x620   :  { %v1031_v19 = vadd.f32 %v1027_v1, %v2365_v11  ;;  %v1023_v63 = vpop.f32.mrb[19].mxu0  ;;  %v1072_v14 = vpop.f32.mrb[27].mxu1  ;;  %v1080_v28 = vadd.f32 %v1076_v25, %v2379_v21  ;;  %v1096_v1 = vrot.slane %v2556_v8, 6 }
 0x621   :  { %v1032_v15 = vadd.f32 %v1028_v16, %v2368_v13  ;;  %v1081_v60 = vadd.f32 %v1077_v29, %v2382_v24 }
 0x622   :  { %v1082_v9 = vmul.f32 0.5, %v1031_v19 }
 0x623   :  { %v1086_v20 = vmul.f32 0.5, %v1032_v15  ;;  %v1091_v5 = vmul.f32 0.5, %v1081_v60 }
 0x624   :  { %1973 = vtanh.f32 %v1082_v9 }
 0x625   :  { %1975 = vtanh.f32 %v1086_v20 }
 0x626   :  { %1977 = vtanh.f32 %v1080_v28 }
 0x627   :  { %1979 = vtanh.f32 %v1091_v5 }
 0x62e   :  { %v1974_v10 = vpop.eup %1973 }
 0x62f   :  { %v1976_v12 = vpop.eup %1975  ;;  %v1084_v22 = vmul.f32 0.5, %v1974_v10  ;;  %v1897_v10 = vld [vmem:[#allocation7 + $0x140] ss:$16 sps:$4 sm:$0xff]  }
 0x630   :  { %v1088_v4 = vmul.f32 0.5, %v1976_v12  ;;  %v1978_v18 = vpop.eup %1977 }
 0x631   :  { %v1085_v0 = vadd.f32 0.5, %v1084_v22  ;;  %v1980_v7 = vpop.eup %1979  ;;  %v1902_v22 = vld [vmem:[#allocation7 + $0x164] ss:$16 sps:$4 sm:$0xff]  }
 0x632   :  { %v1089_v3 = vadd.f32 0.5, %v1088_v4  ;;  %v1093_v27 = vmul.f32 0.5, %v1980_v7  ;;  %v1900_v4 = vld [vmem:[#allocation7 + $0x160] ss:$16 sps:$4 sm:$0xff]   ;;  %v1911_v7 = vld [vmem:[#allocation8 + $0x48] sm:$0xff]  }
 0x633   :  { %v1099_v23 = vmul.f32 %v1978_v18, %v1085_v0  ;;  %v1905_v0 = vld [vmem:[#allocation7 + $0x14c] ss:$16 sps:$4 sm:$0xff]   ;;  %v1366_v18 = vrot.slane %v2241_v26, 7 }
 0x634   :  { %v1098_v16 = vmul.f32 %v1096_v1, %v1089_v3  ;;  %v1094_v19 = vadd.f32 0.5, %v1093_v27  ;;  %v1903_v3 = vld [vmem:[#allocation7 + $0x148] ss:$16 sps:$4 sm:$0xff]   ;;  %v1908_v1 = vld [vmem:[#allocation7 + $0x16c] ss:$16 sps:$4 sm:$0xff]   ;;  %v1913_v27 = vld [vmem:[#allocation8 + $0x50] sm:$0xff]  }
 0x635   :  { %v1912_v26 = vld [vmem:[#allocation8 + $0x8] sm:$0xff]  }
 0x636   :  { %v2598_v17 = vadd.f32 %v1099_v23, %v1098_v16  ;;  %v1906_v23 = vld [vmem:[#allocation7 + $0x168] ss:$16 sps:$4 sm:$0xff]   ;;  %v1909_v16 = vld [vmem:[#allocation8 + $0x40] sm:$0xff]  }
 0x638   :  { %1981 = vtanh.f32 %v2598_v17 }
 0x642   :  { %v1982_v25 = vpop.eup %1981 }
 0x643   :  { %v1102_v63 = vmul.f32 %v1982_v25, %v1094_v19  ;;  %v1914_v19 = vld [vmem:[#allocation8 + $0x10] sm:$0xff]   ;;  %v1915_v25 = vld [vmem:[#allocation8 + $0x58] sm:$0xff]  }
 0x645   :  { %v1103_v14 = vpack.c.bf16 %v1102_v63, %v1102_v63  ;;  %v1916_v63 = vld [vmem:[#allocation8 + $0x18] sm:$0xff]  }
 0x647   :  { %v1105_v15 = vrot.slane %v1103_v14, 1  ;;  %v1918_v14 = vld [vmem:[#allocation8 + $0x20] sm:$0xff]  }
 0x649   :  { %1140 = vmatmul.mubr.bf16.vlgmr.msra.gmra.mrb[20].mxu0 %v1105_v15  ;;  %1189 = vmatmul.mubr.bf16.vlgmr.msra.gmra.mrb[28].mxu1 %v1105_v15  ;;  %v1919_v15 = vld [vmem:[#allocation8 + $0x68] sm:$0xff]  }
 0x64a   :  { %1280 = vmatpush1.bf16.msra.mxu1 %v2255_v31  ;;  %1231 = vmatpush1.bf16.msra.mxu0 %v2253_v30  ;;  %v1899_v30 = vld [vmem:[#allocation7 + $0x144] ss:$16 sps:$4 sm:$0xff]  }
 0x64b   :  { %1281 = vmatprep.subr.bf16.mxu1 %v2263_v33  ;;  %1232 = vmatprep.subr.bf16.mxu0 %v2261_v32 }
 0x64c   :  { %1262 = vmatprep.mubr.bf16.mxu0 %v2104_v2  ;;  %1311 = vmatprep.mubr.bf16.mxu1 %v2104_v2 }
 0x64e   :  { %1282 = vmatpush1.bf16.msra.mxu1 %v2267_v35  ;;  %1233 = vmatpush1.bf16.msra.mxu0 %v2265_v34 }
 0x64f   :  { %1283 = vmatprep.subr.bf16.mxu1 %v2275_v37  ;;  %1234 = vmatprep.subr.bf16.mxu0 %v2273_v36 }
 0x652   :  { %1284 = vmatpush1.bf16.msra.mxu1 %v2279_v39  ;;  %1235 = vmatpush1.bf16.msra.mxu0 %v2277_v38 }
 0x653   :  { %1285 = vmatprep.subr.bf16.mxu1 %v2287_v41  ;;  %1236 = vmatprep.subr.bf16.mxu0 %v2285_v40 }
 0x656   :  { %1286 = vmatpush1.bf16.msra.mxu1 %v2291_v43  ;;  %1237 = vmatpush1.bf16.msra.mxu0 %v2289_v42 }
 0x657   :  { %1287 = vmatprep.subr.bf16.mxu1 %v2297_v45  ;;  %1238 = vmatprep.subr.bf16.mxu0 %v2293_v44 }
 0x65a   :  { %1288 = vmatpush1.bf16.msra.mxu1 %v2303_v47  ;;  %1239 = vmatpush1.bf16.msra.mxu0 %v2301_v46 }
 0x65b   :  { %1289 = vmatprep.subr.bf16.mxu1 %v2309_v49  ;;  %1240 = vmatprep.subr.bf16.mxu0 %v2307_v48 }
 0x65e   :  { %1290 = vmatpush1.bf16.msra.mxu1 %v2315_v51  ;;  %1241 = vmatpush1.bf16.msra.mxu0 %v2313_v50 }
 0x65f   :  { %1291 = vmatprep.subr.bf16.mxu1 %v2321_v53  ;;  %1242 = vmatprep.subr.bf16.mxu0 %v2319_v52 }
 0x662   :  { %1292 = vmatpush1.bf16.msra.mxu1 %v2327_v55  ;;  %1243 = vmatpush1.bf16.msra.mxu0 %v2325_v54 }
 0x663   :  { %1293 = vmatprep.subr.bf16.mxu1 %v2333_v57  ;;  %1244 = vmatprep.subr.bf16.mxu0 %v2331_v56  ;;  %v1219_v57 = vrot.slane %v2598_v17, 6  ;;  %v1910_v17 = vld [vmem:[#allocation8] sm:$0xff]  }
 0x666   :  { %1294 = vmatpush1.bf16.msra.mxu1 %v2339_v59  ;;  %1245 = vmatpush1.bf16.msra.mxu0 %v2337_v58 }
 0x667   :  { %1410 = vmatprep.subr.bf16.mxu1 %v1899_v30  ;;  %1806 = vmatprep.subr.bf16.mxu0 %v1909_v16  ;;  %v1920_v30 = vld [vmem:[#allocation8 + $0x28] sm:$0xff]  }
 0x71c   :  { %v1141_v31 = vpop.f32.mrb[20].mxu0  ;;  %v1190_v32 = vpop.f32.mrb[28].mxu1 }
 0x71d   :  { %v1150_v33 = vrot.slane %v1141_v31, 4  ;;  %v1143_v34 = vpop.f32.mrb[21].mxu0  ;;  %v1192_v35 = vpop.f32.mrb[29].mxu1  ;;  %v1199_v40 = vrot.slane %v1190_v32, 4  ;;  %v1921_v31 = vld [vmem:[#allocation8 + $0x70] sm:$0xff]  }
 0x71e   :  { %v1151_v36 = vrot.slane %v1143_v34, 4  ;;  %v1145_v37 = vpop.f32.mrb[22].mxu0  ;;  %v1194_v38 = vpop.f32.mrb[30].mxu1  ;;  %v1200_v47 = vrot.slane %v1192_v35, 4  ;;  %v1922_v32 = vld [vmem:[#allocation8 + $0x30] sm:$0xff]   ;;  %v1924_v34 = vld [vmem:[#allocation8 + $0x38] sm:$0xff]  }
 0x71f   :  { %v1154_v39 = vadd.f32 %v1150_v33, %v2365_v11  ;;  %v1146_v41 = vpop.f32.mrb[23].mxu0  ;;  %v1195_v42 = vpop.f32.mrb[31].mxu1  ;;  %v1203_v46 = vadd.f32 %v1199_v40, %v2379_v21  ;;  %v1923_v33 = vld [vmem:[#allocation8 + $0x78] sm:$0xff]  }
 0x720   :  { %v1155_v43 = vadd.f32 %v1151_v36, %v2368_v13  ;;  %v1204_v48 = vadd.f32 %v1200_v47, %v2382_v24 }
 0x721   :  { %v1205_v44 = vmul.f32 0.5, %v1154_v39 }
 0x722   :  { %v1209_v45 = vmul.f32 0.5, %v1155_v43  ;;  %v1214_v49 = vmul.f32 0.5, %v1204_v48  ;;  %v1736_v43 = vld [vmem:[%s2679_s4 + $0x1] ss:$4 sm:$0xf] }
 0x723   :  { %1983 = vtanh.f32 %v1205_v44 }
 0x724   :  { %1985 = vtanh.f32 %v1209_v45 }
 0x725   :  { %1987 = vtanh.f32 %v1203_v46 }
 0x726   :  { %1989 = vtanh.f32 %v1214_v49 }
 0x72d   :  { %v1984_v50 = vpop.eup %1983 }
 0x72e   :  { %v1986_v51 = vpop.eup %1985  ;;  %v1207_v52 = vmul.f32 0.5, %v1984_v50  ;;  %v1353_v50 = vrot.slane %v1736_v43, %v186_v62 }
 0x72f   :  { %v1211_v53 = vmul.f32 0.5, %v1986_v51  ;;  %v1988_v55 = vpop.eup %1987 }
 0x730   :  { %v1208_v54 = vadd.f32 0.5, %v1207_v52  ;;  %v1990_v9 = vpop.eup %1989 }
 0x731   :  { %v1212_v56 = vadd.f32 0.5, %v1211_v53  ;;  %v1216_v20 = vmul.f32 0.5, %v1990_v9  ;;  %v2682_v9 = vsub.s32 3, %v2347_v61 }
 0x732   :  { %v1222_v58 = vmul.f32 %v1988_v55, %v1208_v54 }
 0x733   :  { %v1221_v59 = vmul.f32 %v1219_v57, %v1212_v56  ;;  %v1217_v28 = vadd.f32 0.5, %v1216_v20  ;;  %v1361_v20 = vrot.slane %v1736_v43, %v2682_v9 }
 0x735   :  { %v2638_v8 = vadd.f32 %v1222_v58, %v1221_v59 }
 0x737   :  { %1991 = vtanh.f32 %v2638_v8 }
 0x741   :  { %v1992_v29 = vpop.eup %1991 }
 0x742   :  { %v1225_v60 = vmul.f32 %v1992_v29, %v1217_v28 }
 0x744   :  { %v1226_v5 = vpack.c.bf16 %v1225_v60, %v1225_v60 }
 0x746   :  { %v1228_v12 = vrot.slane %v1226_v5, 2 }
 0x748   :  { %1263 = vmatmul.mubr.bf16.vlgmr.msra.gmra.mrb[24].mxu0 %v1228_v12  ;;  %1312 = vmatmul.mubr.bf16.vlgmr.msra.gmra.mrb[32].mxu1 %v1228_v12 }
 0x749   :  { %1411 = vmatpush1.bf16.msra.mxu1 %v1897_v10  ;;  %1442 = vmatprep.mubr.bf16.mxu1 %v2104_v2 }
 0x74a   :  { %1412 = vmatprep.subr.bf16.mxu1 %v1902_v22  ;;  %1807 = vmatpush3.bf16.msra.mxu0 %v1910_v17 }
 0x74b   :  { %1808 = vmatprep.subr.bf16.mxu0 %v1911_v7 }
 0x74d   :  { %1413 = vmatpush1.bf16.msra.mxu1 %v1900_v4 }
 0x74e   :  { %1450 = vmatprep.subr.bf16.mxu1 %v1905_v0  ;;  %1809 = vmatpush3.bf16.msra.mxu0 %v1912_v26 }
 0x74f   :  { %1810 = vmatprep.subr.bf16.mxu0 %v1913_v27 }
 0x750   :  { %1787 = vmatmul.mubr.msk.bf16.vlgmr.msra.gmra.mrb[36].mxu1 %vm244_vm1, %v1366_v18 }
 0x751   :  { %1451 = vmatpush1.bf16.msra.mxu1 %v1903_v3  ;;  %1482 = vmatprep.mubr.bf16.mxu1 %v2104_v2  ;;  %v1917_v2 = vld [vmem:[#allocation8 + $0x60] sm:$0xff]  }
 0x752   :  { %1452 = vmatprep.subr.bf16.mxu1 %v1908_v1  ;;  %1811 = vmatpush3.bf16.msra.mxu0 %v1914_v19  ;;  %v1342_v1 = vrot.slane %v2638_v8, 6 }
 0x753   :  { %1812 = vmatprep.subr.bf16.mxu0 %v1915_v25 }
 0x755   :  { %1453 = vmatpush1.bf16.msra.mxu1 %v1906_v23 }
 0x756   :  { %1813 = vmatpush3.bf16.msra.mxu0 %v1916_v63 }
 0x757   :  { %1814 = vmatprep.subr.bf16.mxu0 %v1917_v2 }
 0x758   :  { %1788 = vmatmul.mubr.msk.bf16.vlgmr.msra.gmra.mrb[40].mxu1 %vm244_vm1, %v1366_v18 }
 0x75a   :  { %1815 = vmatpush3.bf16.msra.mxu0 %v1918_v14 }
 0x75b   :  { %1816 = vmatprep.subr.bf16.mxu0 %v1919_v15 }
 0x75e   :  { %1817 = vmatpush3.bf16.msra.mxu0 %v1920_v30 }
 0x75f   :  { %1818 = vmatprep.subr.bf16.mxu0 %v1921_v31 }
 0x762   :  { %1819 = vmatpush3.bf16.msra.mxu0 %v1922_v32 }
 0x763   :  { %1820 = vmatprep.subr.bf16.mxu0 %v1923_v33 }
 0x766   :  { %1821 = vmatpush3.bf16.msra.mxu0 %v1924_v34 }
 0x81b   :  { %v1264_v35 = vpop.f32.mrb[24].mxu0  ;;  %v1313_v36 = vpop.f32.mrb[32].mxu1 }
 0x81c   :  { %v1273_v37 = vrot.slane %v1264_v35, 2  ;;  %v1266_v38 = vpop.f32.mrb[25].mxu0  ;;  %v1315_v39 = vpop.f32.mrb[33].mxu1  ;;  %v1322_v45 = vrot.slane %v1313_v36, 2 }
 0x81d   :  { %v1274_v40 = vrot.slane %v1266_v38, 2  ;;  %v1268_v41 = vpop.f32.mrb[26].mxu0  ;;  %v1317_v42 = vpop.f32.mrb[34].mxu1  ;;  %v1323_v52 = vrot.slane %v1315_v39, 2 }
 0x81e   :  { %v1277_v44 = vadd.f32 %v1273_v37, %v2365_v11  ;;  %v1269_v46 = vpop.f32.mrb[27].mxu0  ;;  %v1318_v47 = vpop.f32.mrb[35].mxu1  ;;  %v1326_v53 = vadd.f32 %v1322_v45, %v2379_v21  ;;  %v1789_v41 = vld [vmem:[%s2679_s4 + $0x2] ss:$0 sm:$0xff] }
 0x81f   :  { %v1278_v48 = vadd.f32 %v1274_v40, %v2368_v13  ;;  %v1327_v11 = vadd.f32 %v1323_v52, %v2382_v24  ;;  %v1357_v13 = vrot.slane %v1736_v43, %v194_v6 }
 0x820   :  { %v1328_v49 = vmul.f32 0.5, %v1277_v44 }
 0x821   :  { %v1332_v51 = vmul.f32 0.5, %v1278_v48  ;;  %v1337_v62 = vmul.f32 0.5, %v1327_v11 }
 0x822   :  { %1993 = vtanh.f32 %v1328_v49 }
 0x823   :  { %1995 = vtanh.f32 %v1332_v51  ;;  %v1444_v54 = vpop.f32.mrb[36].mxu1 }
 0x824   :  { %v1445_v55 = vadd.f32 %v1444_v54, %v1353_v50  ;;  %v1446_v56 = vpop.f32.mrb[37].mxu1  ;;  %1997 = vtanh.f32 %v1326_v53 }
 0x825   :  { %v1447_v57 = vpop.f32.mrb[38].mxu1 }
 0x826   :  { %v1491_v58 = vmul.f32 0.5, %v1445_v55  ;;  %v1448_v59 = vpop.f32.mrb[39].mxu1 }
 0x828   :  { %1999 = vtanh.f32 %v1491_v58 }
 0x829   :  { %2001 = vtanh.f32 %v1337_v62 }
 0x82b   :  { %v1484_v28 = vpop.f32.mrb[40].mxu1 }
 0x82c   :  { %v1994_v21 = vpop.eup %1993  ;;  %v1485_v29 = vadd.f32 %v1484_v28, %v1357_v13  ;;  %v1486_v60 = vpop.f32.mrb[41].mxu1 }
 0x82d   :  { %v1996_v5 = vpop.eup %1995  ;;  %v1330_v10 = vmul.f32 0.5, %v1994_v21  ;;  %v1487_v24 = vadd.f32 %v1486_v60, %v1361_v20  ;;  %v1488_v12 = vpop.f32.mrb[42].mxu1 }
 0x82e   :  { %v1334_v22 = vmul.f32 0.5, %v1996_v5  ;;  %2003 = vtanh.f32 %v1485_v29  ;;  %v1489_v4 = vpop.f32.mrb[43].mxu1  ;;  %v1998_v3 = vpop.eup %1997 }
 0x82f   :  { %v1331_v0 = vadd.f32 0.5, %v1330_v10  ;;  %v1496_v18 = vmul.f32 0.5, %v1487_v24 }
 0x830   :  { %v1335_v6 = vadd.f32 0.5, %v1334_v22 }
 0x831   :  { %v1345_v61 = vmul.f32 %v1998_v3, %v1331_v0  ;;  %2005 = vtanh.f32 %v1496_v18 }
 0x832   :  { %v2000_v23 = vpop.eup %1999  ;;  %v1344_v16 = vmul.f32 %v1342_v1, %v1335_v6 }
 0x833   :  { %v1493_v17 = vmul.f32 0.5, %v2000_v23  ;;  %v2002_v26 = vpop.eup %2001 }
 0x834   :  { %v1346_v7 = vadd.f32 %v1345_v61, %v1344_v16  ;;  %v1339_v63 = vmul.f32 0.5, %v2002_v26 }
 0x835   :  { %v1494_v27 = vadd.f32 0.5, %v1493_v17 }
 0x836   :  { %2007 = vtanh.f32 %v1346_v7  ;;  %v1340_v14 = vadd.f32 0.5, %v1339_v63 }
 0x838   :  { %v2004_v19 = vpop.eup %2003 }
 0x839   :  { %v1500_v25 = vmul.f32 %v2004_v19, %v1494_v27 }
 0x83b   :  { %2009 = vtanh.f32 %v1500_v25  ;;  %v2006_v2 = vpop.eup %2005 }
 0x83c   :  { %v1498_v30 = vmul.f32 0.5, %v2006_v2 }
 0x83e   :  { %v1499_v32 = vadd.f32 0.5, %v1498_v30 }
 0x840   :  { %v2008_v15 = vpop.eup %2007 }
 0x841   :  { %v1348_v31 = vmul.f32 %v2008_v15, %v1340_v14 }
 0x843   :  { %v1506_v35 = vpack.c.bf16 %v1348_v31, %v1348_v31 }
 0x845   :  { %v2010_v8 = vpop.eup %2009  ;;  %v1546_v38 = vrot.slane %v1506_v35, 3 }
 0x846   :  { %v1502_v33 = vmul.f32 %v2010_v8, %v1499_v32 }
 0x848   :  { %v1504_v34 = vrot.slane %v1502_v33, 2 }
 0x84a   :  { %v1507_v36 = vpack.c.bf16 %v1504_v34, %v1504_v34 }
 0x84c   :  { %v1547_v37 = vrot.slane %v1507_v36, 3 }
 0x84e   :  { %1678 = vmatprep.mubr.bf16.mxu0 %v1547_v37 }
 0x84f   :  { %1679 = vmatmul.mubr.bf16.vlgmr.msra.gmra.mrb[28].mxu0 %v1546_v38 }
 0x922   :  { %v1822_v39 = vpop.f32.mrb[28].mxu0 }
 0x923   :  { %v1823_v40 = vpop.f32.mrb[29].mxu0 }
 0x924   :  { %v1824_v42 = vadd.f32 %v1823_v40, %v1822_v39  ;;  %v1825_v43 = vpop.f32.mrb[30].mxu0 }
 0x925   :  { %v1826_v44 = vpop.f32.mrb[31].mxu0 }
 0x926   :  { %v1681_v45 = vadd.f32 %v1824_v42, %v1789_v41 }
 0x928   :  { %1687 = vst.msk [vmem:[#allocation10] sm:$0x3] %vm1686_vm2, %v1681_v45 }
 0x929   :  { %2078 = shalt.err (!%p2075_p11)
}
 0x92a   :  { %s2079_s4 = scalar_lea.hbm %s2680_s5, 32 }
 0x92b   :  { %p2080_p12 = scmp.ne.s32.totalorder %s2680_s5, %s2079_s4  ;;  %p2083_p13 = scmp.lt.u32.totalorder %s2079_s4, %s2680_s5 }
 0x92d   :  { %p2085_p0 = pnand %p2083_p13, %p2080_p12 }
 0x92f   :  { %2088 = shalt.err (!%p2085_p0)
}
 0x930   :  { %1697 = dma.vmem_to_hbm [thread:$0]  %s1695_s16, 32, %s2680_s5, [#allocation5]  }
 0x931   :  { %2095 = dma.done.wait [#allocation5], 32  }
 0x932   :  { %2096 = vsyncadd [#allocation5], 4294967264 }
 0x933   :  { %1701 = vsyncpa [#allocation4], 1 }
 0x934   :  { %1702 = vsyncpa [#allocation9], 1 }
 0x935   :  { %1703 = vsyncpa [#allocation5], 1 }
 0x936   :  { %1704 = vsyncpa [#allocation6], 1 }

</bundles_post_ra>
